<compile_context>
chip_gen: v7x
topology: tpu7x:2x2x1
jax: 0.10.0
libtpu: 0.0.40
codegen_flags: <defaults>
</compile_context>

<pallas_src>
import functools

import jax
import jax.numpy as jnp
from jax.experimental import pallas as pl
from jax.experimental.pallas import tpu as pltpu

# ----------------------------------------------------------------------------
# Static model dims (lite stand-in sizes)
# ----------------------------------------------------------------------------
PATCH = 4          # dino patch size
D = 32             # dino embed dim
DM = 64            # dino MLP hidden dim
CONV_OUT = 16      # resnet conv output channels
KP = 128           # patch_dim (4*4*3 = 48) padded to 128 lanes
KC = 128           # im2col dim (9*3 = 27) padded to 128 lanes
NC_PAD = 128       # num_classes padded to 128 lanes (lane-dense output)


# ----------------------------------------------------------------------------
# In-kernel helpers
# ----------------------------------------------------------------------------
def _gelu_tanh(x):
    # TODO(synk): PyTorch nn.GELU defaults to the exact erf form; tanh approx
    # is used here (matches the in-file reference).
    return 0.5 * x * (1.0 + jnp.tanh(0.7978845608028654 * (x + 0.044715 * x * x * x)))


def _layernorm(x, g, b, eps=1e-6):
    mu = jnp.mean(x, axis=-1, keepdims=True)
    var = jnp.mean((x - mu) ** 2, axis=-1, keepdims=True)
    return (x - mu) * jax.lax.rsqrt(var + eps) * g + b


# ----------------------------------------------------------------------------
# Fused MixedModel kernel: dino-lite + resnet-lite + weighted mix
# ----------------------------------------------------------------------------
def mixed_kernel(p_ref, patches_ref, cols_ref, wd_ref, vd_ref, wr_ref, vr_ref,
                 o_ref, *, tb, n_patch, hw, d_offs, r_offs):
    f32 = jnp.float32
    bf16 = jnp.bfloat16
    p_dino = p_ref[0, 0]

    def mat(ref, offs, i):            # packed-matrix slice (static offsets)
        o, r, c = offs[i]
        return ref[o:o + r, 0:c]

    def vec(ref, row, c):             # packed-vector slice, f32
        return ref[row:row + 1, 0:c].astype(f32)

    # ------------------- dino-lite branch (batch folded into M) -------------
    x = jnp.dot(patches_ref[...], mat(wd_ref, d_offs, 0),
                preferred_element_type=f32) + vec(vd_ref, 0, D)       # [tb*n, D]

    h = _layernorm(x, vec(vd_ref, 1, D), vec(vd_ref, 2, D)).astype(bf16)
    q = jnp.dot(h, mat(wd_ref, d_offs, 1), preferred_element_type=f32)
    k = jnp.dot(h, mat(wd_ref, d_offs, 2), preferred_element_type=f32)
    v = jnp.dot(h, mat(wd_ref, d_offs, 3), preferred_element_type=f32)

    # per-sample attention via batched einsum (no explicit transpose)
    q3 = q.reshape(tb, n_patch, D).astype(bf16)
    k3 = k.reshape(tb, n_patch, D).astype(bf16)
    v3 = v.reshape(tb, n_patch, D).astype(bf16)
    s = jnp.einsum('bnd,bmd->bnm', q3, k3, preferred_element_type=f32)
    s = s * (D ** -0.5)
    s = s - jnp.max(s, axis=-1, keepdims=True)
    pw = jnp.exp(s)
    pw = pw * pl.reciprocal(jnp.sum(pw, axis=-1, keepdims=True), approx=True)
    a3 = jnp.einsum('bnm,bmd->bnd', pw.astype(bf16), v3,
                    preferred_element_type=f32)
    a = a3.reshape(tb * n_patch, D).astype(bf16)
    x = x + jnp.dot(a, mat(wd_ref, d_offs, 4), preferred_element_type=f32)

    # MLP block
    h = _layernorm(x, vec(vd_ref, 3, D), vec(vd_ref, 4, D)).astype(bf16)
    h1 = jnp.dot(h, mat(wd_ref, d_offs, 5),
                 preferred_element_type=f32) + vec(vd_ref, 5, DM)
    h1 = _gelu_tanh(h1).astype(bf16)
    x = x + jnp.dot(h1, mat(wd_ref, d_offs, 6),
                    preferred_element_type=f32) + vec(vd_ref, 6, D)

    # pool + classifier head (lane-dense padded logits)
    pooled = jnp.mean(x.reshape(tb, n_patch, D), axis=1)              # [tb, D]
    d_logits = jnp.dot(pooled.astype(bf16), mat(wd_ref, d_offs, 7),
                       preferred_element_type=f32) + vec(vd_ref, 7, NC_PAD)

    # ------------------- resnet-lite branch ---------------------------------
    hc = jnp.dot(cols_ref[...], mat(wr_ref, r_offs, 0),
                 preferred_element_type=f32) + vec(vr_ref, 0, CONV_OUT)
    hc = jnp.maximum(hc, 0.0)                                         # [tb*hw, C1]
    pooled_r = jnp.mean(hc.reshape(tb, hw, CONV_OUT), axis=1)         # [tb, C1]
    r_logits = jnp.dot(pooled_r.astype(bf16), mat(wr_ref, r_offs, 1),
                       preferred_element_type=f32) + vec(vr_ref, 1, NC_PAD)

    # ------------------- MixedModel.forward: the mix -------------------------
    o_ref[...] = d_logits * p_dino + r_logits * (1.0 - p_dino)


# ----------------------------------------------------------------------------
# Host-side weight packing (one matrix slab + one vector slab per branch)
# ----------------------------------------------------------------------------
def _pack_matrices(mats):
    offs, parts, cur = [], [], 0
    for m in mats:
        r, c = m.shape
        rp = -(-r // 8) * 8
        buf = jnp.zeros((rp, 128), jnp.float32).at[:r, :c].set(m)
        parts.append(buf)
        offs.append((cur, r, c))
        cur += rp
    return jnp.concatenate(parts, axis=0).astype(jnp.bfloat16), tuple(offs)


def _pack_vectors(vecs):
    rp = -(-len(vecs) // 8) * 8
    buf = jnp.zeros((rp, 128), jnp.float32)
    for i, v in enumerate(vecs):
        flat = v.reshape(-1)
        buf = buf.at[i, :flat.shape[0]].set(flat)
    return buf


# ----------------------------------------------------------------------------
# Host-side data prep: NCHW -> NHWC, patchify, im2col
# ----------------------------------------------------------------------------
def patchify(x_nhwc, p):
    B, H, W, C = x_nhwc.shape
    x = x_nhwc.reshape(B, H // p, p, W // p, p, C)
    x = x.transpose(0, 1, 3, 2, 4, 5)
    return x.reshape(B, (H // p) * (W // p), p * p * C)


def im2col3x3(x_nhwc):
    B, H, W, C = x_nhwc.shape
    xp = jnp.pad(x_nhwc, ((0, 0), (1, 1), (1, 1), (0, 0)))
    cols = [xp[:, di:di + H, dj:dj + W, :] for di in range(3) for dj in range(3)]
    return jnp.concatenate(cols, axis=-1).reshape(B, H * W, 9 * C)


# ----------------------------------------------------------------------------
# Wrapper: one fused pallas_call for the whole MixedModel forward
# ----------------------------------------------------------------------------
def mixed_model_forward(x_nchw, params, p_dino):
    B = x_nchw.shape[0]
    x_nhwc = jnp.transpose(x_nchw, (0, 2, 3, 1))

    # dino patches: [B, N, 48] -> pad K to 128 -> fold batch -> bf16
    patches = patchify(x_nhwc, PATCH)
    N = patches.shape[1]
    patches = jnp.pad(patches, ((0, 0), (0, 0), (0, KP - patches.shape[2])))
    patches = patches.reshape(B * N, KP).astype(jnp.bfloat16)

    # resnet im2col: [B, HW, 27] -> pad K to 128 -> fold batch -> bf16
    # TODO(synk): build the 9 shifted views inside the kernel instead of a
    # host-side im2col to cut the resnet-branch HBM read blow-up.
    cols = im2col3x3(x_nhwc)
    HW = cols.shape[1]
    cols = jnp.pad(cols, ((0, 0), (0, 0), (0, KC - cols.shape[2])))
    cols = cols.reshape(B * HW, KC).astype(jnp.bfloat16)

    dp, rp = params["dino"], params["resnet"]
    num_classes = dp["w_head"].shape[1]

    # pad K / class dims so packed shapes match the kernel's compute shapes
    w_pe_p = jnp.zeros((KP, D), jnp.float32).at[:dp["w_pe"].shape[0], :].set(dp["w_pe"])
    w_head_d = jnp.zeros((D, NC_PAD), jnp.float32).at[:, :num_classes].set(dp["w_head"])
    w_conv_p = jnp.zeros((KC, CONV_OUT), jnp.float32).at[:rp["w_conv"].shape[0], :].set(rp["w_conv"])
    w_head_r = jnp.zeros((CONV_OUT, NC_PAD), jnp.float32).at[:, :num_classes].set(rp["w_head"])

    wd, d_offs = _pack_matrices([w_pe_p, dp["wq"], dp["wk"], dp["wv"], dp["wo"],
                                 dp["w1"], dp["w2"], w_head_d])
    vd = _pack_vectors([dp["b_pe"], dp["ln1_g"], dp["ln1_b"], dp["ln2_g"],
                        dp["ln2_b"], dp["b1"], dp["b2"], dp["b_head"]])
    wr, r_offs = _pack_matrices([w_conv_p, w_head_r])
    vr = _pack_vectors([rp["b_conv"], rp["b_head"]])

    p_arr = jnp.asarray(p_dino, jnp.float32).reshape(1, 1)   # traced scalar

    tb = B                                  # whole (tiny) batch per grid step
    n_tiles = pl.cdiv(B, tb)

    kern = functools.partial(mixed_kernel, tb=tb, n_patch=N, hw=HW,
                             d_offs=d_offs, r_offs=r_offs)

    out = pl.pallas_call(
        kern,
        out_shape=jax.ShapeDtypeStruct((B, NC_PAD), jnp.float32),
        grid=(n_tiles,),
        in_specs=[
            pl.BlockSpec(memory_space=pltpu.MemorySpace.SMEM),       # p_dino
            pl.BlockSpec((tb * N, KP), lambda i: (i, 0)),            # patches slab
            pl.BlockSpec((tb * HW, KC), lambda i: (i, 0)),           # im2col slab
            pl.BlockSpec(wd.shape, lambda i: (0, 0)),                # dino matrices
            pl.BlockSpec(vd.shape, lambda i: (0, 0)),                # dino vectors
            pl.BlockSpec(wr.shape, lambda i: (0, 0)),                # resnet matrices
            pl.BlockSpec(vr.shape, lambda i: (0, 0)),                # resnet vectors
        ],
        out_specs=pl.BlockSpec((tb, NC_PAD), lambda i: (i, 0)),
        compiler_params=pltpu.CompilerParams(dimension_semantics=("parallel",)),
    )(p_arr, patches, cols, wd, vd, wr, vr)

    return out[:, :num_classes]


# ----------------------------------------------------------------------------
# Deterministic parameter init (lite stand-in weights)
# ----------------------------------------------------------------------------
def init_params(key, num_classes, img_c=3):
    patch_dim = PATCH * PATCH * img_c
    conv_in = 9 * img_c
    ks = jax.random.split(key, 16)
    s = 0.05
    n = lambda k, shape: jax.random.normal(k, shape, jnp.float32) * s
    dino = dict(
        w_pe=n(ks[0], (patch_dim, D)), b_pe=jnp.zeros((1, D), jnp.float32),
        ln1_g=jnp.ones((1, D), jnp.float32), ln1_b=jnp.zeros((1, D), jnp.float32),
        wq=n(ks[1], (D, D)), wk=n(ks[2], (D, D)),
        wv=n(ks[3], (D, D)), wo=n(ks[4], (D, D)),
        ln2_g=jnp.ones((1, D), jnp.float32), ln2_b=jnp.zeros((1, D), jnp.float32),
        w1=n(ks[5], (D, DM)), b1=jnp.zeros((1, DM), jnp.float32),
        w2=n(ks[6], (DM, D)), b2=jnp.zeros((1, D), jnp.float32),
        w_head=n(ks[7], (D, num_classes)),
        b_head=jnp.zeros((1, num_classes), jnp.float32),
    )
    resnet = dict(
        w_conv=n(ks[8], (conv_in, CONV_OUT)),
        b_conv=jnp.zeros((1, CONV_OUT), jnp.float32),
        w_head=n(ks[9], (CONV_OUT, num_classes)),
        b_head=jnp.zeros((1, num_classes), jnp.float32),
    )
    return dict(dino=dino, resnet=resnet)


# ----------------------------------------------------------------------------
# Pure-JAX f32 reference (mirrors the kernel math) for a sanity check
# ----------------------------------------------------------------------------
def reference_forward(x_nchw, params, p_dino):
    x_nhwc = jnp.transpose(x_nchw, (0, 2, 3, 1))
    patches = patchify(x_nhwc, PATCH)
    cols = im2col3x3(x_nhwc)
    dp, rp = params["dino"], params["resnet"]

    def ln(x, g, b, eps=1e-6):
        mu = x.mean(-1, keepdims=True)
        var = ((x - mu) ** 2).mean(-1, keepdims=True)
        return (x - mu) * jax.lax.rsqrt(var + eps) * g + b

    x = patches @ dp["w_pe"] + dp["b_pe"]
    h = ln(x, dp["ln1_g"], dp["ln1_b"])
    q, k, v = h @ dp["wq"], h @ dp["wk"], h @ dp["wv"]
    s = jnp.einsum('bnd,bmd->bnm', q, k) * (D ** -0.5)
    s = s - s.max(-1, keepdims=True)
    pw = jnp.exp(s)
    pw = pw / pw.sum(-1, keepdims=True)
    x = x + jnp.einsum('bnm,bmd->bnd', pw, v) @ dp["wo"]
    h = ln(x, dp["ln2_g"], dp["ln2_b"])
    h1 = _gelu_tanh(h @ dp["w1"] + dp["b1"])
    x = x + h1 @ dp["w2"] + dp["b2"]
    d = x.mean(axis=1) @ dp["w_head"] + dp["b_head"]

    hc = jnp.maximum(cols @ rp["w_conv"] + rp["b_conv"], 0.0)
    r = hc.mean(axis=1) @ rp["w_head"] + rp["b_head"]

    return d * p_dino + r * (1.0 - p_dino)


if __name__ == "__main__":
    key = jax.random.PRNGKey(0)
    B, C, H, W = 2, 3, 16, 16
    num_classes = 8
    p_dino = 0.7

    k_x, k_p = jax.random.split(key)
    x_nchw = jax.random.normal(k_x, (B, C, H, W), jnp.float32)   # PyTorch NCHW input
    params = init_params(k_p, num_classes)

    out = jax.block_until_ready(mixed_model_forward(x_nchw, params, p_dino))
    ref = reference_forward(x_nchw, params, p_dino)

    assert out.shape == (B, num_classes)
    assert jnp.allclose(out, ref, atol=3e-2, rtol=3e-2), (out, ref)

    print("KERNEL_OK")
</pallas_src>

<mosaic_0001>
module attributes {stable_mosaic.version = 11 : i64} {
  func.func @mixed_kernel(%arg0: i32, %arg1: memref<1x1xf32, #tpu.memory_space<smem>>, %arg2: memref<32x128xbf16, #tpu.memory_space<vmem>>, %arg3: memref<512x128xbf16, #tpu.memory_space<vmem>>, %arg4: memref<384x128xbf16, #tpu.memory_space<vmem>>, %arg5: memref<8x128xf32, #tpu.memory_space<vmem>>, %arg6: memref<144x128xbf16, #tpu.memory_space<vmem>>, %arg7: memref<8x128xf32, #tpu.memory_space<vmem>>, %arg8: memref<2x128xf32, #tpu.memory_space<vmem>>) attributes {dimension_semantics = [#tpu.dimension_semantics<parallel>], iteration_bounds = array<i64: 1>, scalar_prefetch = 0 : i64, scratch_operands = 0 : i64, tpu.core_type = #tpu.core_type<tc>, window_params = [{transform_indices = @transform_0, window_bounds = array<i64: 1, 1>}, {transform_indices = @transform_1, window_bounds = array<i64: 32, 128>}, {transform_indices = @transform_2, window_bounds = array<i64: 512, 128>}, {pipeline_mode = #tpu.pipeline_mode<synchronous>, transform_indices = @transform_3, window_bounds = array<i64: 384, 128>}, {pipeline_mode = #tpu.pipeline_mode<synchronous>, transform_indices = @transform_4, window_bounds = array<i64: 8, 128>}, {pipeline_mode = #tpu.pipeline_mode<synchronous>, transform_indices = @transform_5, window_bounds = array<i64: 144, 128>}, {pipeline_mode = #tpu.pipeline_mode<synchronous>, transform_indices = @transform_6, window_bounds = array<i64: 8, 128>}, {transform_indices = @transform_7, window_bounds = array<i64: 2, 128>}]} {
    %c0 = arith.constant 0 : index
    %c0_0 = arith.constant 0 : index
    %0 = memref.load %arg1[%c0, %c0_0] : memref<1x1xf32, #tpu.memory_space<smem>>
    %c0_1 = arith.constant 0 : index
    %c0_2 = arith.constant 0 : index
    %1 = vector.load %arg2[%c0_1, %c0_2] : memref<32x128xbf16, #tpu.memory_space<vmem>>, vector<32x128xbf16>
    %c0_3 = arith.constant 0 : index
    %c0_4 = arith.constant 0 : index
    %2 = vector.load %arg4[%c0_3, %c0_4] : memref<384x128xbf16, #tpu.memory_space<vmem>>, vector<128x32xbf16>
    %cst = arith.constant dense<0.000000e+00> : vector<32x32xf32>
    %3 = tpu.matmul %1, %2, %cst {dimension_numbers = #tpu.dot_dimension_numbers<[1], [0], [0], [1], [0, 0, 1, 1], [], []>} : vector<32x128xbf16>, vector<128x32xbf16>, vector<32x32xf32> -> vector<32x32xf32>
    %c0_5 = arith.constant 0 : index
    %c0_6 = arith.constant 0 : index
    %4 = vector.load %arg5[%c0_5, %c0_6] : memref<8x128xf32, #tpu.memory_space<vmem>>, vector<1x32xf32>
    %5 = vector.broadcast %4 : vector<1x32xf32> to vector<32x32xf32>
    %6 = arith.addf %3, %5 : vector<32x32xf32>
    %c1 = arith.constant 1 : index
    %c0_7 = arith.constant 0 : index
    %7 = vector.load %arg5[%c1, %c0_7] : memref<8x128xf32, #tpu.memory_space<vmem>>, vector<1x32xf32>
    %c2 = arith.constant 2 : index
    %c0_8 = arith.constant 0 : index
    %8 = vector.load %arg5[%c2, %c0_8] : memref<8x128xf32, #tpu.memory_space<vmem>>, vector<1x32xf32>
    %cst_9 = arith.constant dense<0.000000e+00> : vector<32xf32>
    %9 = vector.multi_reduction <add>, %6, %cst_9 [1] : vector<32x32xf32> to vector<32xf32>
    %10 = vector.shape_cast %9 : vector<32xf32> to vector<32x1xf32>
    %cst_10 = arith.constant 3.200000e+01 : f32
    %11 = vector.broadcast %cst_10 : f32 to vector<32x1xf32>
    %12 = arith.divf %10, %11 : vector<32x1xf32>
    %13 = vector.broadcast %12 : vector<32x1xf32> to vector<32x32xf32>
    %14 = arith.subf %6, %13 : vector<32x32xf32>
    %15 = arith.mulf %14, %14 : vector<32x32xf32>
    %cst_11 = arith.constant dense<0.000000e+00> : vector<32xf32>
    %16 = vector.multi_reduction <add>, %15, %cst_11 [1] : vector<32x32xf32> to vector<32xf32>
    %17 = vector.shape_cast %16 : vector<32xf32> to vector<32x1xf32>
    %cst_12 = arith.constant 3.200000e+01 : f32
    %18 = vector.broadcast %cst_12 : f32 to vector<32x1xf32>
    %19 = arith.divf %17, %18 : vector<32x1xf32>
    %20 = vector.broadcast %12 : vector<32x1xf32> to vector<32x32xf32>
    %21 = arith.subf %6, %20 : vector<32x32xf32>
    %cst_13 = arith.constant 9.99999997E-7 : f32
    %22 = vector.broadcast %cst_13 : f32 to vector<32x1xf32>
    %23 = arith.addf %19, %22 : vector<32x1xf32>
    %24 = math.rsqrt %23 : vector<32x1xf32>
    %25 = vector.broadcast %24 : vector<32x1xf32> to vector<32x32xf32>
    %26 = arith.mulf %21, %25 : vector<32x32xf32>
    %27 = vector.broadcast %7 : vector<1x32xf32> to vector<32x32xf32>
    %28 = arith.mulf %26, %27 : vector<32x32xf32>
    %29 = vector.broadcast %8 : vector<1x32xf32> to vector<32x32xf32>
    %30 = arith.addf %28, %29 : vector<32x32xf32>
    %31 = arith.truncf %30 : vector<32x32xf32> to vector<32x32xbf16>
    %c128 = arith.constant 128 : index
    %c0_14 = arith.constant 0 : index
    %32 = vector.load %arg4[%c128, %c0_14] : memref<384x128xbf16, #tpu.memory_space<vmem>>, vector<32x32xbf16>
    %cst_15 = arith.constant dense<0.000000e+00> : vector<32x32xf32>
    %33 = tpu.matmul %31, %32, %cst_15 {dimension_numbers = #tpu.dot_dimension_numbers<[1], [0], [0], [1], [0, 0, 1, 1], [], []>} : vector<32x32xbf16>, vector<32x32xbf16>, vector<32x32xf32> -> vector<32x32xf32>
    %c160 = arith.constant 160 : index
    %c0_16 = arith.constant 0 : index
    %34 = vector.load %arg4[%c160, %c0_16] : memref<384x128xbf16, #tpu.memory_space<vmem>>, vector<32x32xbf16>
    %cst_17 = arith.constant dense<0.000000e+00> : vector<32x32xf32>
    %35 = tpu.matmul %31, %34, %cst_17 {dimension_numbers = #tpu.dot_dimension_numbers<[1], [0], [0], [1], [0, 0, 1, 1], [], []>} : vector<32x32xbf16>, vector<32x32xbf16>, vector<32x32xf32> -> vector<32x32xf32>
    %c192 = arith.constant 192 : index
    %c0_18 = arith.constant 0 : index
    %36 = vector.load %arg4[%c192, %c0_18] : memref<384x128xbf16, #tpu.memory_space<vmem>>, vector<32x32xbf16>
    %cst_19 = arith.constant dense<0.000000e+00> : vector<32x32xf32>
    %37 = tpu.matmul %31, %36, %cst_19 {dimension_numbers = #tpu.dot_dimension_numbers<[1], [0], [0], [1], [0, 0, 1, 1], [], []>} : vector<32x32xbf16>, vector<32x32xbf16>, vector<32x32xf32> -> vector<32x32xf32>
    %38 = vector.shape_cast %33 : vector<32x32xf32> to vector<2x16x32xf32>
    %39 = arith.truncf %38 : vector<2x16x32xf32> to vector<2x16x32xbf16>
    %40 = vector.shape_cast %35 : vector<32x32xf32> to vector<2x16x32xf32>
    %41 = arith.truncf %40 : vector<2x16x32xf32> to vector<2x16x32xbf16>
    %42 = vector.shape_cast %37 : vector<32x32xf32> to vector<2x16x32xf32>
    %43 = arith.truncf %42 : vector<2x16x32xf32> to vector<2x16x32xbf16>
    "tpu.trace_start"() <{level = 10 : i32, message = "bnd,bmd->bnm"}> : () -> ()
    %cst_20 = arith.constant dense<0.000000e+00> : vector<2x16x16xf32>
    %44 = tpu.matmul %39, %41, %cst_20 {dimension_numbers = #tpu.dot_dimension_numbers<[2], [2], [1], [1], [0, 0, 0, 1, 1, 1], [0], [0]>} : vector<2x16x32xbf16>, vector<2x16x32xbf16>, vector<2x16x16xf32> -> vector<2x16x16xf32>
    "tpu.trace_stop"() : () -> ()
    %cst_21 = arith.constant 0.176776692 : f32
    %45 = vector.broadcast %cst_21 : f32 to vector<2x16x16xf32>
    %46 = arith.mulf %44, %45 : vector<2x16x16xf32>
    %cst_22 = arith.constant dense<0xFF800000> : vector<2x16xf32>
    %47 = vector.multi_reduction <maximumf>, %46, %cst_22 [2] : vector<2x16x16xf32> to vector<2x16xf32>
    %48 = vector.shape_cast %47 : vector<2x16xf32> to vector<2x16x1xf32>
    %49 = vector.broadcast %48 : vector<2x16x1xf32> to vector<2x16x16xf32>
    %50 = arith.subf %46, %49 : vector<2x16x16xf32>
    %51 = math.exp %50 : vector<2x16x16xf32>
    %cst_23 = arith.constant dense<0.000000e+00> : vector<2x16xf32>
    %52 = vector.multi_reduction <add>, %51, %cst_23 [2] : vector<2x16x16xf32> to vector<2x16xf32>
    %53 = vector.shape_cast %52 : vector<2x16xf32> to vector<2x16x1xf32>
    %54 = tpu.reciprocal %53 {approx = true} : vector<2x16x1xf32> -> vector<2x16x1xf32>
    %55 = vector.broadcast %54 : vector<2x16x1xf32> to vector<2x16x16xf32>
    %56 = arith.mulf %51, %55 : vector<2x16x16xf32>
    %57 = arith.truncf %56 : vector<2x16x16xf32> to vector<2x16x16xbf16>
    "tpu.trace_start"() <{level = 10 : i32, message = "bnm,bmd->bnd"}> : () -> ()
    %cst_24 = arith.constant dense<0.000000e+00> : vector<2x16x32xf32>
    %58 = tpu.matmul %57, %43, %cst_24 {dimension_numbers = #tpu.dot_dimension_numbers<[2], [1], [1], [2], [0, 0, 0, 1, 1, 2], [0], [0]>} : vector<2x16x16xbf16>, vector<2x16x32xbf16>, vector<2x16x32xf32> -> vector<2x16x32xf32>
    "tpu.trace_stop"() : () -> ()
    %59 = vector.shape_cast %58 : vector<2x16x32xf32> to vector<32x32xf32>
    %60 = arith.truncf %59 : vector<32x32xf32> to vector<32x32xbf16>
    %c224 = arith.constant 224 : index
    %c0_25 = arith.constant 0 : index
    %61 = vector.load %arg4[%c224, %c0_25] : memref<384x128xbf16, #tpu.memory_space<vmem>>, vector<32x32xbf16>
    %cst_26 = arith.constant dense<0.000000e+00> : vector<32x32xf32>
    %62 = tpu.matmul %60, %61, %cst_26 {dimension_numbers = #tpu.dot_dimension_numbers<[1], [0], [0], [1], [0, 0, 1, 1], [], []>} : vector<32x32xbf16>, vector<32x32xbf16>, vector<32x32xf32> -> vector<32x32xf32>
    %63 = arith.addf %6, %62 : vector<32x32xf32>
    %c3 = arith.constant 3 : index
    %c0_27 = arith.constant 0 : index
    %64 = vector.load %arg5[%c3, %c0_27] : memref<8x128xf32, #tpu.memory_space<vmem>>, vector<1x32xf32>
    %c4 = arith.constant 4 : index
    %c0_28 = arith.constant 0 : index
    %65 = vector.load %arg5[%c4, %c0_28] : memref<8x128xf32, #tpu.memory_space<vmem>>, vector<1x32xf32>
    %cst_29 = arith.constant dense<0.000000e+00> : vector<32xf32>
    %66 = vector.multi_reduction <add>, %63, %cst_29 [1] : vector<32x32xf32> to vector<32xf32>
    %67 = vector.shape_cast %66 : vector<32xf32> to vector<32x1xf32>
    %cst_30 = arith.constant 3.200000e+01 : f32
    %68 = vector.broadcast %cst_30 : f32 to vector<32x1xf32>
    %69 = arith.divf %67, %68 : vector<32x1xf32>
    %70 = vector.broadcast %69 : vector<32x1xf32> to vector<32x32xf32>
    %71 = arith.subf %63, %70 : vector<32x32xf32>
    %72 = arith.mulf %71, %71 : vector<32x32xf32>
    %cst_31 = arith.constant dense<0.000000e+00> : vector<32xf32>
    %73 = vector.multi_reduction <add>, %72, %cst_31 [1] : vector<32x32xf32> to vector<32xf32>
    %74 = vector.shape_cast %73 : vector<32xf32> to vector<32x1xf32>
    %cst_32 = arith.constant 3.200000e+01 : f32
    %75 = vector.broadcast %cst_32 : f32 to vector<32x1xf32>
    %76 = arith.divf %74, %75 : vector<32x1xf32>
    %77 = vector.broadcast %69 : vector<32x1xf32> to vector<32x32xf32>
    %78 = arith.subf %63, %77 : vector<32x32xf32>
    %cst_33 = arith.constant 9.99999997E-7 : f32
    %79 = vector.broadcast %cst_33 : f32 to vector<32x1xf32>
    %80 = arith.addf %76, %79 : vector<32x1xf32>
    %81 = math.rsqrt %80 : vector<32x1xf32>
    %82 = vector.broadcast %81 : vector<32x1xf32> to vector<32x32xf32>
    %83 = arith.mulf %78, %82 : vector<32x32xf32>
    %84 = vector.broadcast %64 : vector<1x32xf32> to vector<32x32xf32>
    %85 = arith.mulf %83, %84 : vector<32x32xf32>
    %86 = vector.broadcast %65 : vector<1x32xf32> to vector<32x32xf32>
    %87 = arith.addf %85, %86 : vector<32x32xf32>
    %88 = arith.truncf %87 : vector<32x32xf32> to vector<32x32xbf16>
    %c256 = arith.constant 256 : index
    %c0_34 = arith.constant 0 : index
    %89 = vector.load %arg4[%c256, %c0_34] : memref<384x128xbf16, #tpu.memory_space<vmem>>, vector<32x64xbf16>
    %cst_35 = arith.constant dense<0.000000e+00> : vector<32x64xf32>
    %90 = tpu.matmul %88, %89, %cst_35 {dimension_numbers = #tpu.dot_dimension_numbers<[1], [0], [0], [1], [0, 0, 1, 1], [], []>} : vector<32x32xbf16>, vector<32x64xbf16>, vector<32x64xf32> -> vector<32x64xf32>
    %c5 = arith.constant 5 : index
    %c0_36 = arith.constant 0 : index
    %91 = vector.load %arg5[%c5, %c0_36] : memref<8x128xf32, #tpu.memory_space<vmem>>, vector<1x64xf32>
    %92 = vector.broadcast %91 : vector<1x64xf32> to vector<32x64xf32>
    %93 = arith.addf %90, %92 : vector<32x64xf32>
    %cst_37 = arith.constant 5.000000e-01 : f32
    %94 = vector.broadcast %cst_37 : f32 to vector<32x64xf32>
    %95 = arith.mulf %94, %93 : vector<32x64xf32>
    %cst_38 = arith.constant 4.471500e-02 : f32
    %96 = vector.broadcast %cst_38 : f32 to vector<32x64xf32>
    %97 = arith.mulf %96, %93 : vector<32x64xf32>
    %98 = arith.mulf %97, %93 : vector<32x64xf32>
    %99 = arith.mulf %98, %93 : vector<32x64xf32>
    %100 = arith.addf %93, %99 : vector<32x64xf32>
    %cst_39 = arith.constant 0.797884583 : f32
    %101 = vector.broadcast %cst_39 : f32 to vector<32x64xf32>
    %102 = arith.mulf %101, %100 : vector<32x64xf32>
    %103 = math.tanh %102 : vector<32x64xf32>
    %cst_40 = arith.constant 1.000000e+00 : f32
    %104 = vector.broadcast %cst_40 : f32 to vector<32x64xf32>
    %105 = arith.addf %104, %103 : vector<32x64xf32>
    %106 = arith.mulf %95, %105 : vector<32x64xf32>
    %107 = arith.truncf %106 : vector<32x64xf32> to vector<32x64xbf16>
    %c288 = arith.constant 288 : index
    %c0_41 = arith.constant 0 : index
    %108 = vector.load %arg4[%c288, %c0_41] : memref<384x128xbf16, #tpu.memory_space<vmem>>, vector<64x32xbf16>
    %cst_42 = arith.constant dense<0.000000e+00> : vector<32x32xf32>
    %109 = tpu.matmul %107, %108, %cst_42 {dimension_numbers = #tpu.dot_dimension_numbers<[1], [0], [0], [1], [0, 0, 1, 1], [], []>} : vector<32x64xbf16>, vector<64x32xbf16>, vector<32x32xf32> -> vector<32x32xf32>
    %110 = arith.addf %63, %109 : vector<32x32xf32>
    %c6 = arith.constant 6 : index
    %c0_43 = arith.constant 0 : index
    %111 = vector.load %arg5[%c6, %c0_43] : memref<8x128xf32, #tpu.memory_space<vmem>>, vector<1x32xf32>
    %112 = vector.broadcast %111 : vector<1x32xf32> to vector<32x32xf32>
    %113 = arith.addf %110, %112 : vector<32x32xf32>
    %114 = vector.shape_cast %113 : vector<32x32xf32> to vector<2x16x32xf32>
    %cst_44 = arith.constant dense<0.000000e+00> : vector<2x32xf32>
    %115 = vector.multi_reduction <add>, %114, %cst_44 [1] : vector<2x16x32xf32> to vector<2x32xf32>
    %cst_45 = arith.constant 1.600000e+01 : f32
    %116 = vector.broadcast %cst_45 : f32 to vector<2x32xf32>
    %117 = arith.divf %115, %116 : vector<2x32xf32>
    %118 = arith.truncf %117 : vector<2x32xf32> to vector<2x32xbf16>
    %c352 = arith.constant 352 : index
    %c0_46 = arith.constant 0 : index
    %119 = vector.load %arg4[%c352, %c0_46] : memref<384x128xbf16, #tpu.memory_space<vmem>>, vector<32x128xbf16>
    %cst_47 = arith.constant dense<0.000000e+00> : vector<2x128xf32>
    %120 = tpu.matmul %118, %119, %cst_47 {dimension_numbers = #tpu.dot_dimension_numbers<[1], [0], [0], [1], [0, 0, 1, 1], [], []>} : vector<2x32xbf16>, vector<32x128xbf16>, vector<2x128xf32> -> vector<2x128xf32>
    %c7 = arith.constant 7 : index
    %c0_48 = arith.constant 0 : index
    %121 = vector.load %arg5[%c7, %c0_48] : memref<8x128xf32, #tpu.memory_space<vmem>>, vector<1x128xf32>
    %122 = vector.broadcast %121 : vector<1x128xf32> to vector<2x128xf32>
    %123 = arith.addf %120, %122 : vector<2x128xf32>
    %c0_49 = arith.constant 0 : index
    %c0_50 = arith.constant 0 : index
    %124 = vector.load %arg3[%c0_49, %c0_50] : memref<512x128xbf16, #tpu.memory_space<vmem>>, vector<512x128xbf16>
    %c0_51 = arith.constant 0 : index
    %c0_52 = arith.constant 0 : index
    %125 = vector.load %arg6[%c0_51, %c0_52] : memref<144x128xbf16, #tpu.memory_space<vmem>>, vector<128x16xbf16>
    %cst_53 = arith.constant dense<0.000000e+00> : vector<512x16xf32>
    %126 = tpu.matmul %124, %125, %cst_53 {dimension_numbers = #tpu.dot_dimension_numbers<[1], [0], [0], [1], [0, 0, 1, 1], [], []>} : vector<512x128xbf16>, vector<128x16xbf16>, vector<512x16xf32> -> vector<512x16xf32>
    %c0_54 = arith.constant 0 : index
    %c0_55 = arith.constant 0 : index
    %127 = vector.load %arg7[%c0_54, %c0_55] : memref<8x128xf32, #tpu.memory_space<vmem>>, vector<1x16xf32>
    %128 = vector.broadcast %127 : vector<1x16xf32> to vector<512x16xf32>
    %129 = arith.addf %126, %128 : vector<512x16xf32>
    %cst_56 = arith.constant 0.000000e+00 : f32
    %130 = vector.broadcast %cst_56 : f32 to vector<512x16xf32>
    %131 = arith.maximumf %129, %130 : vector<512x16xf32>
    %132 = vector.shape_cast %131 : vector<512x16xf32> to vector<2x256x16xf32>
    %cst_57 = arith.constant dense<0.000000e+00> : vector<2x16xf32>
    %133 = vector.multi_reduction <add>, %132, %cst_57 [1] : vector<2x256x16xf32> to vector<2x16xf32>
    %cst_58 = arith.constant 2.560000e+02 : f32
    %134 = vector.broadcast %cst_58 : f32 to vector<2x16xf32>
    %135 = arith.divf %133, %134 : vector<2x16xf32>
    %136 = arith.truncf %135 : vector<2x16xf32> to vector<2x16xbf16>
    %c128_59 = arith.constant 128 : index
    %c0_60 = arith.constant 0 : index
    %137 = vector.load %arg6[%c128_59, %c0_60] : memref<144x128xbf16, #tpu.memory_space<vmem>>, vector<16x128xbf16>
    %cst_61 = arith.constant dense<0.000000e+00> : vector<2x128xf32>
    %138 = tpu.matmul %136, %137, %cst_61 {dimension_numbers = #tpu.dot_dimension_numbers<[1], [0], [0], [1], [0, 0, 1, 1], [], []>} : vector<2x16xbf16>, vector<16x128xbf16>, vector<2x128xf32> -> vector<2x128xf32>
    %c1_62 = arith.constant 1 : index
    %c0_63 = arith.constant 0 : index
    %139 = vector.load %arg7[%c1_62, %c0_63] : memref<8x128xf32, #tpu.memory_space<vmem>>, vector<1x128xf32>
    %140 = vector.broadcast %139 : vector<1x128xf32> to vector<2x128xf32>
    %141 = arith.addf %138, %140 : vector<2x128xf32>
    %142 = vector.broadcast %0 : f32 to vector<2x128xf32>
    %143 = arith.mulf %123, %142 : vector<2x128xf32>
    %cst_64 = arith.constant 1.000000e+00 : f32
    %144 = arith.subf %cst_64, %0 : f32
    %145 = vector.broadcast %144 : f32 to vector<2x128xf32>
    %146 = arith.mulf %141, %145 : vector<2x128xf32>
    %147 = arith.addf %143, %146 : vector<2x128xf32>
    %c0_65 = arith.constant 0 : index
    %c0_66 = arith.constant 0 : index
    %148 = vector.load %arg8[%c0_65, %c0_66] : memref<2x128xf32, #tpu.memory_space<vmem>>, vector<2x128xf32>
    tpu.vector_store %arg8[%c0_65, %c0_66], %147 {strides = array<i32>} : memref<2x128xf32, #tpu.memory_space<vmem>>, vector<2x128xf32>,
    return
  }
  func.func @transform_0(%arg0: i32) -> (i32, i32) {
    %c0_i32 = arith.constant 0 : i32
    %c0_i32_0 = arith.constant 0 : i32
    %c0_i32_1 = arith.constant 0 : i32
    return %c0_i32, %c0_i32_0 : i32, i32
  }
  func.func @transform_1(%arg0: i32) -> (i32, i32) {
    %c0_i32 = arith.constant 0 : i32
    %c0_i32_0 = arith.constant 0 : i32
    return %arg0, %c0_i32 : i32, i32
  }
  func.func @transform_2(%arg0: i32) -> (i32, i32) {
    %c0_i32 = arith.constant 0 : i32
    %c0_i32_0 = arith.constant 0 : i32
    return %arg0, %c0_i32 : i32, i32
  }
  func.func @transform_3(%arg0: i32) -> (i32, i32) {
    %c0_i32 = arith.constant 0 : i32
    %c0_i32_0 = arith.constant 0 : i32
    %c0_i32_1 = arith.constant 0 : i32
    return %c0_i32, %c0_i32_0 : i32, i32
  }
  func.func @transform_4(%arg0: i32) -> (i32, i32) {
    %c0_i32 = arith.constant 0 : i32
    %c0_i32_0 = arith.constant 0 : i32
    %c0_i32_1 = arith.constant 0 : i32
    return %c0_i32, %c0_i32_0 : i32, i32
  }
  func.func @transform_5(%arg0: i32) -> (i32, i32) {
    %c0_i32 = arith.constant 0 : i32
    %c0_i32_0 = arith.constant 0 : i32
    %c0_i32_1 = arith.constant 0 : i32
    return %c0_i32, %c0_i32_0 : i32, i32
  }
  func.func @transform_6(%arg0: i32) -> (i32, i32) {
    %c0_i32 = arith.constant 0 : i32
    %c0_i32_0 = arith.constant 0 : i32
    %c0_i32_1 = arith.constant 0 : i32
    return %c0_i32, %c0_i32_0 : i32, i32
  }
  func.func @transform_7(%arg0: i32) -> (i32, i32) {
    %c0_i32 = arith.constant 0 : i32
    %c0_i32_0 = arith.constant 0 : i32
    return %arg0, %c0_i32 : i32, i32
  }
}

</mosaic_0001>

<bundles_post_ra>
// kernel: tpu_custom_call.1
= control target key start
LH: loop header
LB: loop body
LE: loop exit
PB: predicated region body
PF: predicated region fallthrough
CT: control target
= control target key end

     0   :  { %13 = vsyncpa [#allocation4], 0  ;;  %s3269_s0 = inlined_call_operand.<no memory space> [shape: f32[1,1], index: 0, kind: input, shape index: {}]   ;;  %s3270_s1 = inlined_call_operand.hbm [shape: bf16[32,128], index: 1, kind: input, shape index: {}]   ;;  %s3271_s2 = inlined_call_operand.hbm [shape: bf16[512,128], index: 2, kind: input, shape index: {}]   ;;  %s3272_s3 = inlined_call_operand.hbm [shape: bf16[384,128], index: 3, kind: input, shape index: {}]   ;;  %s3273_s4 = inlined_call_operand.vmem [shape: f32[8,128], index: 4, kind: input, shape index: {}]   ;;  %s3274_s5 = inlined_call_operand.hbm [shape: bf16[144,128], index: 5, kind: input, shape index: {}]   ;;  %s3275_s6 = inlined_call_operand.vmem [shape: f32[8,128], index: 6, kind: input, shape index: {}]   ;;  %s3276_s7 = inlined_call_operand.hbm [shape: f32[2,128], index: 7, kind: output, shape index: {}]  }
   0x1   :  { %14 = vsyncpa [#allocation7], 0 }
   0x2   :  { %15 = vsyncpa [#allocation10], 0 }
   0x3   :  { %16 = vsyncpa [#allocation5], 0  ;;  %s2722_s24 = smov [#allocation6]   ;;  %s2723_s26 = smov [#allocation3]  }
   0x4   :  { %s36_s25 = sshll.u32 %s2722_s24, 4  ;;  %s24_s27 = sshll.u32 %s2723_s26, 4  ;;  %s37_s25 = int_to_ptr.vmem [resolvable:$true] %s36_s25  ;;  %s2771_s27 = int_to_ptr.vmem [resolvable:$true] %s24_s27 }
   0x5   :  { %s2604_s30 = scalar_lea.hbm %s3271_s2, 4096 }
   0x6   :  { %p2605_p0 = scmp.ne.s32.totalorder %s3271_s2, %s2604_s30  ;;  %p2608_p1 = scmp.lt.u32.totalorder %s2604_s30, %s3271_s2 }
   0x8   :  { %p2610_p2 = pnand %p2608_p1, %p2605_p0 }
   0xa   :  { %2613 = shalt.err (!%p2610_p2)
}
   0xb   :  { %s2614_s12 = scalar_lea.vmem %s37_s25, 4096  ;;  %p2619_p4 = scmp.lt.s32.totalorder %s37_s25, %s37_s25 }
   0xc   :  { %p2615_p3 = scmp.ne.s32.totalorder %s37_s25, %s2614_s12  ;;  %p2620_p5 = scmp.lt.s32.totalorder %s2614_s12, %s2614_s12 }
   0xe   :  { %p2621_p6 = por %p2620_p5, %p2619_p4 }
  0x10   :  { %p2622_p7 = pnand %p2621_p6, %p2615_p3 }
  0x12   :  { %2625 = shalt.err (!%p2622_p7)
}
  0x13   :  { %s2724_s13 = smov 64   ;;  %s2725_s14 = smov 4  }
  0x14   :  { %42 = dma.hbm_to_vmem [thread:$0]  %s3271_s2, 4096, %s37_s25, [#allocation7], %s2724_s13, %s2724_s13, %s2725_s14  }
  0x15   :  { %s2626_s19 = scalar_lea.hbm %s3270_s1, 256 }
  0x16   :  { %p2627_p8 = scmp.ne.s32.totalorder %s3270_s1, %s2626_s19  ;;  %p2630_p9 = scmp.lt.u32.totalorder %s2626_s19, %s3270_s1 }
  0x18   :  { %p2632_p10 = pnand %p2630_p9, %p2627_p8 }
  0x1a   :  { %2635 = shalt.err (!%p2632_p10)
}
  0x1b   :  { %s2636_s24 = scalar_lea.vmem %s2771_s27, 256  ;;  %p2641_p12 = scmp.lt.s32.totalorder %s2771_s27, %s2771_s27 }
  0x1c   :  { %p2637_p11 = scmp.ne.s32.totalorder %s2771_s27, %s2636_s24  ;;  %p2642_p13 = scmp.lt.s32.totalorder %s2636_s24, %s2636_s24 }
  0x1e   :  { %p2643_p0 = por %p2642_p13, %p2641_p12 }
  0x20   :  { %p2644_p1 = pnand %p2643_p0, %p2637_p11 }
  0x22   :  { %2647 = shalt.err (!%p2644_p1)
}
  0x23   :  { %30 = dma.hbm_to_vmem [thread:$0]  %s3270_s1, 256, %s2771_s27, [#allocation4], %s2724_s13, %s2724_s13, %s2725_s14  }
  0x24   :  { %s2726_s26 = smov [#allocation8]   ;;  %s2727_s29 = smov [#allocation9]  }
  0x25   :  { %s48_s28 = sshll.u32 %s2726_s26, 4  ;;  %s62_s30 = sshll.u32 %s2727_s29, 4  ;;  %s49_s28 = int_to_ptr.vmem [resolvable:$true] %s48_s28  ;;  %s2808_s30 = int_to_ptr.vmem [resolvable:$true] %s62_s30 }
  0x26   :  { %s2648_s10 = scalar_lea.hbm %s3272_s3, 3072 }
  0x27   :  { %p2649_p2 = scmp.ne.s32.totalorder %s3272_s3, %s2648_s10  ;;  %p2652_p3 = scmp.lt.u32.totalorder %s2648_s10, %s3272_s3 }
  0x29   :  { %p2654_p4 = pnand %p2652_p3, %p2649_p2 }
  0x2b   :  { %2657 = shalt.err (!%p2654_p4)
}
  0x2c   :  { %s2658_s1 = scalar_lea.vmem %s49_s28, 3072  ;;  %p2663_p6 = scmp.lt.s32.totalorder %s49_s28, %s49_s28 }
  0x2d   :  { %p2659_p5 = scmp.ne.s32.totalorder %s49_s28, %s2658_s1  ;;  %p2664_p7 = scmp.lt.s32.totalorder %s2658_s1, %s2658_s1 }
  0x2f   :  { %p2665_p8 = por %p2664_p7, %p2663_p6 }
  0x31   :  { %p2666_p9 = pnand %p2665_p8, %p2659_p5 }
  0x33   :  { %2669 = shalt.err (!%p2666_p9)
}
  0x34   :  { %54 = dma.hbm_to_vmem [thread:$0]  %s3272_s3, 3072, %s49_s28, [#allocation7], %s2724_s13, %s2724_s13, %s2725_s14  }
  0x35   :  { %s2670_s20 = scalar_lea.hbm %s3274_s5, 1152 }
  0x36   :  { %p2671_p10 = scmp.ne.s32.totalorder %s3274_s5, %s2670_s20  ;;  %p2674_p11 = scmp.lt.u32.totalorder %s2670_s20, %s3274_s5 }
  0x38   :  { %p2676_p12 = pnand %p2674_p11, %p2671_p10 }
  0x3a   :  { %2679 = shalt.err (!%p2676_p12)
}
  0x3b   :  { %s2680_s2 = scalar_lea.vmem %s2808_s30, 1152  ;;  %p2685_p0 = scmp.lt.s32.totalorder %s2808_s30, %s2808_s30 }
  0x3c   :  { %p2681_p13 = scmp.ne.s32.totalorder %s2808_s30, %s2680_s2  ;;  %p2686_p1 = scmp.lt.s32.totalorder %s2680_s2, %s2680_s2 }
  0x3e   :  { %p2687_p2 = por %p2686_p1, %p2685_p0 }
  0x40   :  { %p2688_p3 = pnand %p2687_p2, %p2681_p13 }
  0x42   :  { %2691 = shalt.err (!%p2688_p3)
}
  0x43   :  { %68 = dma.hbm_to_vmem [thread:$0]  %s3274_s5, 1152, %s2808_s30, [#allocation10], %s2724_s13, %s2724_s13, %s2725_s14  }
  0x44   :  { %2714 = dma.done.wait [#allocation4], 256  }
  0x45   :  { %2715 = vsyncadd [#allocation4], 4294967040 }
  0x46   :  { %2716 = dma.done.wait [#allocation7], 7168  }
  0x47   :  { %2717 = vsyncadd [#allocation7], 4294960128 }
  0x48   :  { %2718 = dma.done.wait [#allocation10], 1152  }
  0x49   :  { %2719 = vsyncadd [#allocation10], 4294966144  ;;  %v2497_v0 = vld [vmem:[#allocation8] sm:$0xff]   ;;  %v2498_v1 = vld [vmem:[#allocation8 + $0x8] sm:$0xff]   ;;  %vm221_vm0 = vcmask 261120   ;;  %vm2729_vm1 = vmmov 0  }
  0x4a   :  { %2282 = vmatprep.subr.bf16.mxu0 %v2497_v0  ;;  %v2499_v2 = vld [vmem:[#allocation8 + $0x10] sm:$0xff]   ;;  %v2500_v3 = vld [vmem:[#allocation8 + $0x18] sm:$0xff]   ;;  %v2501_v5 = vld [vmem:[#allocation8 + $0x20] sm:$0xff]   ;;  %vm598_vm2 = vcmask 130048   ;;  %vm1028_vm3 = vcmask 523264   ;;  %vm1133_vm4 = vcmask 1041409  }
  0x4b   :  { %2283 = vmatpush3.bf16.msra.mxu0 %v2497_v0  ;;  %v2505_v4 = vld [vmem:[#allocation3] sm:$0xff]   ;;  %v2502_v6 = vld [vmem:[#allocation8 + $0x28] sm:$0xff]   ;;  %v2504_v8 = vld [vmem:[#allocation8 + $0x38] sm:$0xff]   ;;  %s2076_s21 = ssub.f32 1.0, %s3269_s0 }
  0x4c   :  { %2284 = vmatprep.subr.bf16.mxu0 %v2498_v1  ;;  %2298 = vmatprep.mubr.bf16.mxu0 %v2505_v4  ;;  %v2503_v7 = vld [vmem:[#allocation8 + $0x30] sm:$0xff]   ;;  %v2506_v9 = vld [vmem:[#allocation3 + $0x8] sm:$0xff]   ;;  %v2507_v43 = vld [vmem:[#allocation8 + $0x40] sm:$0xff]  }
  0x4d   :  { %v2098_v10 = vld [vmem:[%s3273_s4] ss:$0 sm:$0xff]  ;;  %v2508_v44 = vld [vmem:[#allocation8 + $0x48] sm:$0xff]   ;;  %2302 = vmatprep.subr.bf16.mxu1 %v2507_v43  ;;  %v2109_v60 = vld [vmem:[%s3273_s4 + $0x1] ss:$0 sm:$0xff] }
  0x4e   :  { %2303 = vmatpush3.bf16.msra.mxu1 %v2507_v43  ;;  %v2509_v45 = vld [vmem:[#allocation8 + $0x50] sm:$0xff]  }
  0x4f   :  { %2285 = vmatpush3.bf16.msra.mxu0 %v2498_v1  ;;  %2304 = vmatprep.subr.bf16.mxu1 %v2508_v44 }
  0x50   :  { %2286 = vmatprep.subr.bf16.mxu0 %v2499_v2 }
  0x52   :  { %2305 = vmatpush3.bf16.msra.mxu1 %v2508_v44 }
  0x53   :  { %2287 = vmatpush3.bf16.msra.mxu0 %v2499_v2  ;;  %2310 = vmatprep.subr.bf16.mxu1 %v2509_v45  ;;  %v2110_v2 = vld [vmem:[%s3273_s4 + $0x2] ss:$0 sm:$0xff] }
  0x54   :  { %2288 = vmatprep.subr.bf16.mxu0 %v2500_v3 }
  0x57   :  { %2289 = vmatpush3.bf16.msra.mxu0 %v2500_v3 }
  0x58   :  { %2290 = vmatprep.subr.bf16.mxu0 %v2501_v5 }
  0x5b   :  { %2291 = vmatpush3.bf16.msra.mxu0 %v2501_v5 }
  0x5c   :  { %2292 = vmatprep.subr.bf16.mxu0 %v2502_v6 }
  0x5f   :  { %2293 = vmatpush3.bf16.msra.mxu0 %v2502_v6 }
  0x60   :  { %2294 = vmatprep.subr.bf16.mxu0 %v2503_v7 }
  0x63   :  { %2295 = vmatpush3.bf16.msra.mxu0 %v2503_v7 }
  0x64   :  { %2296 = vmatprep.subr.bf16.mxu0 %v2504_v8 }
  0x67   :  { %2297 = vmatpush3.bf16.msra.mxu0 %v2504_v8 }
  0x6a   :  { %2299 = vmatmul.mubr.bf16.vlgmr.msra.gmra.mrb[0].mxu0 %v2506_v9 }
 0x13d   :  { %v2300_v11 = vpop.f32.mrb[0].mxu0 }
 0x13e   :  { %v2848_v12 = vadd.f32 %v2300_v11, %v2098_v10  ;;  %v204_v13 = vpop.f32.mrb[1].mxu0 }
 0x13f   :  { %v2850_v14 = vadd.f32 %v2098_v10, %v204_v13  ;;  %v2301_v15 = vpop.f32.mrb[2].mxu0 }
 0x140   :  { %v2852_v16 = vadd.f32 %v2301_v15, %v2098_v10  ;;  %v207_v17 = vpop.f32.mrb[3].mxu0  ;;  %v228_v18 = vsel %vm221_vm0, %v2848_v12, 0.0 }
 0x141   :  { %v2856_v19 = vadd.f32 %v2098_v10, %v207_v17  ;;  %229 = vadd.xlane.f32.xlu1 %v228_v18  ;;  %v222_v20 = vsel %vm221_vm0, %v2850_v14, 0.0  ;;  %v2510_v17 = vld [vmem:[#allocation8 + $0x58] sm:$0xff]   ;;  %v2511_v18 = vld [vmem:[#allocation8 + $0x60] sm:$0xff]  }
 0x142   :  { %223 = vadd.xlane.f32.xlu0 %v222_v20  ;;  %v231_v21 = vsel %vm221_vm0, %v2852_v16, 0.0  ;;  %v2512_v20 = vld [vmem:[#allocation8 + $0x68] sm:$0xff]  }
 0x143   :  { %v225_v22 = vsel %vm221_vm0, %v2856_v19, 0.0 }
 0x145   :  { %232 = vadd.xlane.f32.xlu1 %v231_v21  ;;  %v2728_v21 = vmov 0.0  }
 0x146   :  { %226 = vadd.xlane.f32.xlu0 %v225_v22  ;;  %2332 = vmatprep.subr.bf16.mxu0 %v2728_v21 }
 0x147   :  { %2334 = vmatprep.mubr.msk.bf16.mxu0 %vm2729_vm1, %v2728_v21 }
 0x1ce   :  { %v230_v23 = vpop.xlane.xlu1 %229 }
 0x1cf   :  { %v237_v24 = vmul.f32 0.03125, %v230_v23  ;;  %v224_v25 = vpop.xlane.xlu0 %223 }
 0x1d0   :  { %v235_v26 = vmul.f32 0.03125, %v224_v25 }
 0x1d1   :  { %v241_v27 = vsub.f32 %v2848_v12, %v237_v24 }
 0x1d2   :  { %v239_v28 = vsub.f32 %v2850_v14, %v235_v26  ;;  %v233_v29 = vpop.xlane.xlu1 %232 }
 0x1d3   :  { %v238_v30 = vmul.f32 0.03125, %v233_v29  ;;  %v227_v31 = vpop.xlane.xlu0 %226  ;;  %v245_v37 = vmul.f32 %v241_v27, %v241_v27 }
 0x1d4   :  { %v236_v32 = vmul.f32 0.03125, %v227_v31  ;;  %v243_v33 = vmul.f32 %v239_v28, %v239_v28 }
 0x1d5   :  { %v242_v34 = vsub.f32 %v2852_v16, %v238_v30  ;;  %v253_v39 = vsel %vm221_vm0, %v245_v37, 0.0 }
 0x1d6   :  { %v240_v35 = vsub.f32 %v2856_v19, %v236_v32  ;;  %v247_v36 = vsel %vm221_vm0, %v243_v33, 0.0 }
 0x1d7   :  { %248 = vadd.xlane.f32.xlu0 %v247_v36  ;;  %v246_v41 = vmul.f32 %v242_v34, %v242_v34 }
 0x1d8   :  { %v244_v38 = vmul.f32 %v240_v35, %v240_v35 }
 0x1d9   :  { %v256_v42 = vsel %vm221_vm0, %v246_v41, 0.0 }
 0x1da   :  { %v250_v40 = vsel %vm221_vm0, %v244_v38, 0.0 }
 0x1db   :  { %254 = vadd.xlane.f32.xlu0 %v253_v39  ;;  %251 = vadd.xlane.f32.xlu1 %v250_v40 }
 0x1df   :  { %257 = vadd.xlane.f32.xlu1 %v256_v42 }
 0x264   :  { %v249_v46 = vpop.xlane.xlu0 %248 }
 0x265   :  { %v259_v47 = vmul.f32 0.03125, %v249_v46 }
 0x267   :  { %v263_v48 = vadd.f32 1e-06, %v259_v47 }
 0x268   :  { %v252_v49 = vpop.xlane.xlu1 %251  ;;  %v255_v50 = vpop.xlane.xlu0 %254 }
 0x269   :  { %2564 = vrsqrt.f32 %v263_v48  ;;  %v260_v51 = vmul.f32 0.03125, %v252_v49  ;;  %v261_v52 = vmul.f32 0.03125, %v255_v50 }
 0x26b   :  { %v264_v53 = vadd.f32 1e-06, %v260_v51  ;;  %v265_v54 = vadd.f32 1e-06, %v261_v52 }
 0x26c   :  { %v258_v55 = vpop.xlane.xlu1 %257 }
 0x26d   :  { %2566 = vrsqrt.f32 %v264_v53  ;;  %v262_v56 = vmul.f32 0.03125, %v258_v55 }
 0x26e   :  { %2568 = vrsqrt.f32 %v265_v54 }
 0x26f   :  { %v266_v57 = vadd.f32 1e-06, %v262_v56 }
 0x271   :  { %2570 = vrsqrt.f32 %v266_v57 }
 0x273   :  { %v2565_v58 = vpop.eup %2564 }
 0x274   :  { %v271_v59 = vmul.f32 %v2565_v58, %v239_v28 }
 0x276   :  { %v279_v0 = vmul.f32 %v2109_v60, %v271_v59 }
 0x277   :  { %v2567_v61 = vpop.eup %2566 }
 0x278   :  { %v2569_v62 = vpop.eup %2568  ;;  %v272_v63 = vmul.f32 %v2567_v61, %v240_v35  ;;  %v287_v6 = vadd.f32 %v2110_v2, %v279_v0 }
 0x279   :  { %v273_v1 = vmul.f32 %v2569_v62, %v241_v27 }
 0x27a   :  { %v280_v3 = vmul.f32 %v2109_v60, %v272_v63 }
 0x27b   :  { %v2571_v4 = vpop.eup %2570  ;;  %v281_v8 = vmul.f32 %v2109_v60, %v273_v1 }
 0x27c   :  { %v274_v5 = vmul.f32 %v2571_v4, %v242_v34  ;;  %v288_v7 = vadd.f32 %v2110_v2, %v280_v3 }
 0x27d   :  { %v289_v11 = vadd.f32 %v2110_v2, %v281_v8 }
 0x27e   :  { %v291_v9 = vpack.c.bf16 %v288_v7, %v287_v6  ;;  %v282_v10 = vmul.f32 %v2109_v60, %v274_v5 }
 0x280   :  { %2306 = vmatprep.mubr.msk.bf16.mxu1 %vm221_vm0, %v291_v9  ;;  %v290_v13 = vadd.f32 %v2110_v2, %v282_v10 }
 0x282   :  { %v292_v15 = vpack.c.bf16 %v290_v13, %v289_v11 }
 0x284   :  { %2307 = vmatmul.mubr.msk.bf16.vlgmr.msra.gmra.mrb[0].mxu1 %vm221_vm0, %v292_v15 }
 0x285   :  { %2311 = vmatpush3.bf16.msra.mxu1 %v2509_v45  ;;  %2314 = vmatprep.mubr.msk.bf16.mxu1 %vm221_vm0, %v291_v9 }
 0x286   :  { %2312 = vmatprep.subr.bf16.mxu1 %v2510_v17 }
 0x289   :  { %2313 = vmatpush3.bf16.msra.mxu1 %v2510_v17 }
 0x28a   :  { %2318 = vmatprep.subr.bf16.mxu1 %v2511_v18 }
 0x28c   :  { %2315 = vmatmul.mubr.msk.bf16.vlgmr.msra.gmra.mrb[4].mxu1 %vm221_vm0, %v292_v15 }
 0x28d   :  { %2319 = vmatpush3.bf16.msra.mxu1 %v2511_v18  ;;  %2322 = vmatprep.mubr.msk.bf16.mxu1 %vm221_vm0, %v291_v9 }
 0x28e   :  { %2320 = vmatprep.subr.bf16.mxu1 %v2512_v20 }
 0x291   :  { %2321 = vmatpush3.bf16.msra.mxu1 %v2512_v20 }
 0x292   :  { %2326 = vmatprep.subr.bf16.mxu1 %v2728_v21 }
 0x294   :  { %2323 = vmatmul.mubr.msk.bf16.vlgmr.msra.gmra.mrb[8].mxu1 %vm221_vm0, %v292_v15 }
 0x295   :  { %2328 = vmatprep.mubr.msk.bf16.mxu1 %vm2729_vm1, %v2728_v21 }
 0x357   :  { %v2308_v22 = vpop.f32.mrb[0].mxu1 }
 0x358   :  { %v349_v23 = vpop.f32.mrb[1].mxu1 }
 0x359   :  { %v2309_v24 = vpop.f32.mrb[2].mxu1 }
 0x35a   :  { %v495_v25 = vpack.c.bf16 %v2309_v24, %v2308_v22  ;;  %v352_v26 = vpop.f32.mrb[3].mxu1 }
 0x35b   :  { %v494_v27 = vpack.c.bf16 %v352_v26, %v349_v23 }
 0x35f   :  { %v2316_v28 = vpop.f32.mrb[4].mxu1 }
 0x360   :  { %v414_v29 = vpop.f32.mrb[5].mxu1 }
 0x361   :  { %v2317_v30 = vpop.f32.mrb[6].mxu1 }
 0x362   :  { %v497_v31 = vpack.c.bf16 %v2317_v30, %v2316_v28  ;;  %v417_v32 = vpop.f32.mrb[7].mxu1 }
 0x363   :  { %v496_v33 = vpack.c.bf16 %v417_v32, %v414_v29 }
 0x364   :  { %v551_v34 = vsel %vm221_vm0, %v497_v31, 0 }
 0x365   :  { %v504_v35 = vsel %vm221_vm0, %v496_v33, 0  ;;  %2333 = vmatpush3.bf16.xpose.msra.mxu0 %v551_v34  ;;  %v2513_v33 = vld [vmem:[#allocation8 + $0x70] sm:$0xff]   ;;  %v2514_v34 = vld [vmem:[#allocation8 + $0x78] sm:$0xff]  }
 0x366   :  { %2327 = vmatpush3.bf16.xpose.msra.mxu1 %v504_v35  ;;  %2344 = vmatprep.subr.bf16.mxu0 %v2728_v21 }
 0x367   :  { %v2324_v36 = vpop.f32.mrb[8].mxu1  ;;  %2338 = vmatprep.subr.bf16.mxu1 %v2728_v21 }
 0x368   :  { %v479_v37 = vpop.f32.mrb[9].mxu1 }
 0x369   :  { %v2325_v38 = vpop.f32.mrb[10].mxu1 }
 0x36a   :  { %v499_v39 = vpack.c.bf16 %v2325_v38, %v2324_v36  ;;  %v482_v40 = vpop.f32.mrb[11].mxu1 }
 0x36b   :  { %v498_v41 = vpack.c.bf16 %v482_v40, %v479_v37 }
 0x36c   :  { %2335 = vmatmul.mubr.msk.bf16.vlgmr.msra.gmra.mrb[4].mxu0 %vm221_vm0, %v495_v25 }
 0x36d   :  { %2329 = vmatmul.mubr.msk.bf16.vlgmr.msra.gmra.mrb[12].mxu1 %vm221_vm0, %v494_v27  ;;  %2345 = vmatpush3.bf16.msra.mxu0 %v499_v39 }
 0x36e   :  { %2339 = vmatpush3.bf16.msra.mxu1 %v498_v41  ;;  %2340 = vmatprep.mubr.msk.bf16.mxu1 %vm2729_vm1, %v2728_v21 }
 0x36f   :  { %2346 = vmatprep.mubr.msk.bf16.mxu0 %vm2729_vm1, %v2728_v21  ;;  %2350 = vmatprep.subr.bf16.mxu1 %v2513_v33 }
 0x43f   :  { %v587_v42 = vpop.f32.mrb[4].mxu0 }
 0x440   :  { %v540_v43 = vpop.f32.mrb[12].mxu1  ;;  %v2336_v44 = vpop.f32.mrb[5].mxu0  ;;  %v596_v50 = vmul.f32 0.17677669, %v587_v42 }
 0x441   :  { %v594_v45 = vmul.f32 0.17677669, %v540_v43  ;;  %v2330_v46 = vpop.f32.mrb[13].mxu1  ;;  %v590_v47 = vpop.f32.mrb[6].mxu0 }
 0x442   :  { %v543_v48 = vpop.f32.mrb[14].mxu1  ;;  %v2337_v49 = vpop.f32.mrb[7].mxu0  ;;  %v597_v54 = vmul.f32 0.17677669, %v590_v47  ;;  %v605_v56 = vsel %vm598_vm2, %v596_v50, -inf }
 0x443   :  { %v595_v51 = vmul.f32 0.17677669, %v543_v48  ;;  %v2331_v52 = vpop.f32.mrb[15].mxu1  ;;  %v599_v53 = vsel %vm598_vm2, %v594_v45, -inf }
 0x444   :  { %600 = vmax.xlane.f32.xlu0 %v599_v53  ;;  %v608_v57 = vsel %vm598_vm2, %v597_v54, -inf }
 0x445   :  { %v602_v55 = vsel %vm598_vm2, %v595_v51, -inf }
 0x446   :  { %603 = vmax.xlane.f32.xlu1 %v602_v55 }
 0x448   :  { %606 = vmax.xlane.f32.xlu0 %v605_v56 }
 0x44a   :  { %609 = vmax.xlane.f32.xlu1 %v608_v57 }
 0x4d1   :  { %v601_v58 = vpop.xlane.xlu0 %600 }
 0x4d2   :  { %v611_v59 = vsub.f32 %v594_v45, %v601_v58 }
 0x4d3   :  { %v604_v60 = vpop.xlane.xlu1 %603 }
 0x4d4   :  { %v615_v61 = vmul.f32 1.442695, %v611_v59  ;;  %v612_v62 = vsub.f32 %v595_v51, %v604_v60 }
 0x4d5   :  { %v607_v63 = vpop.xlane.xlu0 %606 }
 0x4d6   :  { %2572 = vpow2.f32 %v615_v61  ;;  %v617_v0 = vmul.f32 1.442695, %v612_v62  ;;  %v613_v1 = vsub.f32 %v596_v50, %v607_v63 }
 0x4d7   :  { %v610_v2 = vpop.xlane.xlu1 %609 }
 0x4d8   :  { %2574 = vpow2.f32 %v617_v0  ;;  %v619_v3 = vmul.f32 1.442695, %v613_v1  ;;  %v614_v4 = vsub.f32 %v597_v54, %v610_v2 }
 0x4da   :  { %2576 = vpow2.f32 %v619_v3  ;;  %v621_v5 = vmul.f32 1.442695, %v614_v4 }
 0x4dc   :  { %2578 = vpow2.f32 %v621_v5 }
 0x4e0   :  { %v2573_v6 = vpop.eup %2572 }
 0x4e1   :  { %v623_v7 = vsel %vm598_vm2, %v2573_v6, 0.0 }
 0x4e2   :  { %v2575_v8 = vpop.eup %2574  ;;  %624 = vadd.xlane.f32.xlu0 %v623_v7 }
 0x4e3   :  { %v626_v9 = vsel %vm598_vm2, %v2575_v8, 0.0 }
 0x4e4   :  { %v2577_v10 = vpop.eup %2576  ;;  %627 = vadd.xlane.f32.xlu1 %v626_v9  ;;  %v2515_v9 = vld [vmem:[#allocation8 + $0x80] sm:$0xff]  }
 0x4e5   :  { %v629_v11 = vsel %vm598_vm2, %v2577_v10, 0.0  ;;  %2358 = vmatprep.subr.bf16.mxu0 %v2515_v9 }
 0x4e6   :  { %v2579_v13 = vpop.eup %2578  ;;  %630 = vadd.xlane.f32.xlu0 %v629_v11 }
 0x4e7   :  { %v632_v15 = vsel %vm598_vm2, %v2579_v13, 0.0 }
 0x4e8   :  { %633 = vadd.xlane.f32.xlu1 %v632_v15 }
 0x56f   :  { %v625_v17 = vpop.xlane.xlu0 %624 }
 0x570   :  { %2580 = vrcp.f32 %v625_v17 }
 0x571   :  { %v628_v18 = vpop.xlane.xlu1 %627 }
 0x572   :  { %2582 = vrcp.f32 %v628_v18 }
 0x573   :  { %v631_v20 = vpop.xlane.xlu0 %630 }
 0x574   :  { %2584 = vrcp.f32 %v631_v20 }
 0x575   :  { %v634_v22 = vpop.xlane.xlu1 %633 }
 0x576   :  { %2586 = vrcp.f32 %v634_v22 }
 0x57a   :  { %v2581_v23 = vpop.eup %2580 }
 0x57b   :  { %v639_v25 = vmul.f32 %v2581_v23, %v2573_v6 }
 0x57c   :  { %v2583_v24 = vpop.eup %2582 }
 0x57d   :  { %v640_v26 = vmul.f32 %v2583_v24, %v2575_v8 }
 0x57e   :  { %v2585_v27 = vpop.eup %2584 }
 0x57f   :  { %v643_v28 = vpack.c.bf16 %v640_v26, %v639_v25  ;;  %v641_v30 = vmul.f32 %v2585_v27, %v2577_v10  ;;  %v2516_v10 = vld [vmem:[#allocation8 + $0x88] sm:$0xff]  }
 0x580   :  { %v2587_v29 = vpop.eup %2586 }
 0x581   :  { %v642_v31 = vmul.f32 %v2587_v29, %v2579_v13  ;;  %2341 = vmatmul.mubr.msk.bf16.vlgmr.msra.gmra.mrb[16].mxu1 %vm598_vm2, %v643_v28  ;;  %v2131_v29 = vld [vmem:[%s3273_s4 + $0x3] ss:$0 sm:$0xff] }
 0x582   :  { %2351 = vmatpush3.bf16.msra.mxu1 %v2513_v33 }
 0x583   :  { %v644_v32 = vpack.c.bf16 %v642_v31, %v641_v30  ;;  %2352 = vmatprep.subr.bf16.mxu1 %v2514_v34 }
 0x585   :  { %2347 = vmatmul.mubr.msk.bf16.vlgmr.msra.gmra.mrb[8].mxu0 %vm598_vm2, %v644_v32 }
 0x586   :  { %2353 = vmatpush3.bf16.msra.mxu1 %v2514_v34  ;;  %2359 = vmatpush3.bf16.msra.mxu0 %v2515_v9 }
 0x587   :  { %2360 = vmatprep.subr.bf16.mxu0 %v2516_v10 }
 0x58a   :  { %2361 = vmatpush3.bf16.msra.mxu0 %v2516_v10 }
 0x58b   :  { %2378 = vmatprep.subr.bf16.mxu0 %v2728_v21 }
 0x654   :  { %v682_v35 = vpop.f32.mrb[16].mxu1 }
 0x655   :  { %v2342_v36 = vpop.f32.mrb[17].mxu1 }
 0x656   :  { %v685_v37 = vpop.f32.mrb[18].mxu1 }
 0x657   :  { %v733_v38 = vpack.c.bf16 %v685_v37, %v682_v35  ;;  %v2343_v39 = vpop.f32.mrb[19].mxu1  ;;  %v2132_v35 = vld [vmem:[%s3273_s4 + $0x4] ss:$0 sm:$0xff] }
 0x658   :  { %v726_v40 = vpop.f32.mrb[8].mxu0 }
 0x659   :  { %v2348_v41 = vpop.f32.mrb[9].mxu0  ;;  %2354 = vmatprep.mubr.msk.bf16.mxu1 %vm221_vm0, %v733_v38 }
 0x65a   :  { %v729_v42 = vpop.f32.mrb[10].mxu0 }
 0x65b   :  { %v734_v43 = vpack.c.bf16 %v729_v42, %v726_v40  ;;  %v2349_v44 = vpop.f32.mrb[11].mxu0 }
 0x65d   :  { %2355 = vmatmul.mubr.msk.bf16.vlgmr.msra.gmra.mrb[20].mxu1 %vm221_vm0, %v734_v43 }
 0x730   :  { %v2356_v45 = vpop.f32.mrb[20].mxu1 }
 0x731   :  { %v791_v46 = vpop.f32.mrb[21].mxu1  ;;  %v2916_v50 = vadd.f32 %v2356_v45, %v2848_v12 }
 0x732   :  { %v2913_v47 = vadd.f32 %v791_v46, %v2850_v14  ;;  %v2357_v48 = vpop.f32.mrb[22].mxu1 }
 0x733   :  { %v794_v49 = vpop.f32.mrb[23].mxu1  ;;  %v2924_v53 = vadd.f32 %v2357_v48, %v2852_v16  ;;  %v818_v14 = vsel %vm221_vm0, %v2916_v50, 0.0 }
 0x734   :  { %v2919_v51 = vadd.f32 %v794_v49, %v2856_v19  ;;  %v812_v52 = vsel %vm221_vm0, %v2913_v47, 0.0  ;;  %v2517_v49 = vld [vmem:[#allocation8 + $0x90] sm:$0xff]  }
 0x735   :  { %813 = vadd.xlane.f32.xlu0 %v812_v52  ;;  %v821_v12 = vsel %vm221_vm0, %v2924_v53, 0.0  ;;  %v2518_v52 = vld [vmem:[#allocation8 + $0x98] sm:$0xff]   ;;  %2366 = vmatprep.subr.bf16.mxu1 %v2517_v49 }
 0x736   :  { %v815_v54 = vsel %vm221_vm0, %v2919_v51, 0.0  ;;  %2367 = vmatpush3.bf16.msra.mxu1 %v2517_v49  ;;  %v2980_v49 = vld [vmem:[#allocation9 + $0x30] sm:$0xff]  }
 0x737   :  { %816 = vadd.xlane.f32.xlu1 %v815_v54  ;;  %2368 = vmatprep.subr.bf16.mxu1 %v2518_v52  ;;  %v2519_v54 = vld [vmem:[#allocation8 + $0xa0] sm:$0xff]  }
 0x739   :  { %819 = vadd.xlane.f32.xlu0 %v818_v14  ;;  %v2520_v14 = vld [vmem:[#allocation8 + $0xa8] sm:$0xff]  }
 0x73a   :  { %2369 = vmatpush3.bf16.msra.mxu1 %v2518_v52  ;;  %v2984_v52 = vld [vmem:[#allocation9 + $0x38] sm:$0xff]  }
 0x73b   :  { %822 = vadd.xlane.f32.xlu1 %v821_v12  ;;  %2370 = vmatprep.subr.bf16.mxu1 %v2519_v54  ;;  %v2133_v12 = vld [vmem:[%s3273_s4 + $0x5] ss:$0 sm:$0xff] }
 0x73e   :  { %2371 = vmatpush3.bf16.msra.mxu1 %v2519_v54  ;;  %v2144_v54 = vld [vmem:[%s3273_s4 + $0x6] ss:$0 sm:$0xff] }
 0x73f   :  { %2372 = vmatprep.subr.bf16.mxu1 %v2520_v14 }
 0x742   :  { %2373 = vmatpush3.bf16.msra.mxu1 %v2520_v14 }
 0x7c2   :  { %v814_v19 = vpop.xlane.xlu0 %813 }
 0x7c3   :  { %v824_v55 = vmul.f32 0.03125, %v814_v19 }
 0x7c4   :  { %v817_v56 = vpop.xlane.xlu1 %816 }
 0x7c5   :  { %v828_v57 = vsub.f32 %v2913_v47, %v824_v55  ;;  %v825_v58 = vmul.f32 0.03125, %v817_v56 }
 0x7c6   :  { %v820_v16 = vpop.xlane.xlu0 %819 }
 0x7c7   :  { %v829_v59 = vsub.f32 %v2919_v51, %v825_v58  ;;  %v826_v60 = vmul.f32 0.03125, %v820_v16  ;;  %v832_v61 = vmul.f32 %v828_v57, %v828_v57 }
 0x7c8   :  { %v823_v62 = vpop.xlane.xlu1 %822 }
 0x7c9   :  { %v830_v63 = vsub.f32 %v2916_v50, %v826_v60  ;;  %v827_v0 = vmul.f32 0.03125, %v823_v62  ;;  %v836_v1 = vsel %vm221_vm0, %v832_v61, 0.0  ;;  %v833_v2 = vmul.f32 %v829_v59, %v829_v59 }
 0x7ca   :  { %837 = vadd.xlane.f32.xlu0 %v836_v1 }
 0x7cb   :  { %v831_v3 = vsub.f32 %v2924_v53, %v827_v0  ;;  %v839_v4 = vsel %vm221_vm0, %v833_v2, 0.0  ;;  %v834_v5 = vmul.f32 %v830_v63, %v830_v63 }
 0x7cc   :  { %840 = vadd.xlane.f32.xlu1 %v839_v4 }
 0x7cd   :  { %v842_v6 = vsel %vm221_vm0, %v834_v5, 0.0  ;;  %v835_v7 = vmul.f32 %v831_v3, %v831_v3 }
 0x7ce   :  { %843 = vadd.xlane.f32.xlu0 %v842_v6 }
 0x7cf   :  { %v845_v8 = vsel %vm221_vm0, %v835_v7, 0.0 }
 0x7d0   :  { %846 = vadd.xlane.f32.xlu1 %v845_v8 }
 0x857   :  { %v838_v11 = vpop.xlane.xlu0 %837 }
 0x858   :  { %v848_v13 = vmul.f32 0.03125, %v838_v11 }
 0x859   :  { %v841_v15 = vpop.xlane.xlu1 %840 }
 0x85a   :  { %v852_v17 = vadd.f32 1e-06, %v848_v13  ;;  %v849_v18 = vmul.f32 0.03125, %v841_v15 }
 0x85b   :  { %v844_v20 = vpop.xlane.xlu0 %843 }
 0x85c   :  { %2588 = vrsqrt.f32 %v852_v17  ;;  %v853_v22 = vadd.f32 1e-06, %v849_v18  ;;  %v850_v23 = vmul.f32 0.03125, %v844_v20 }
 0x85d   :  { %v847_v24 = vpop.xlane.xlu1 %846 }
 0x85e   :  { %2590 = vrsqrt.f32 %v853_v22  ;;  %v854_v25 = vadd.f32 1e-06, %v850_v23  ;;  %v851_v26 = vmul.f32 0.03125, %v847_v24 }
 0x860   :  { %2592 = vrsqrt.f32 %v854_v25  ;;  %v855_v27 = vadd.f32 1e-06, %v851_v26 }
 0x862   :  { %2594 = vrsqrt.f32 %v855_v27 }
 0x866   :  { %v2589_v28 = vpop.eup %2588 }
 0x867   :  { %v860_v30 = vmul.f32 %v2589_v28, %v828_v57 }
 0x868   :  { %v2591_v31 = vpop.eup %2590 }
 0x869   :  { %v861_v32 = vmul.f32 %v2591_v31, %v829_v59  ;;  %v868_v33 = vmul.f32 %v2131_v29, %v860_v30 }
 0x86a   :  { %v2593_v34 = vpop.eup %2592 }
 0x86b   :  { %v862_v36 = vmul.f32 %v2593_v34, %v830_v63  ;;  %v869_v37 = vmul.f32 %v2131_v29, %v861_v32  ;;  %v876_v41 = vadd.f32 %v2132_v35, %v868_v33 }
 0x86c   :  { %v2595_v38 = vpop.eup %2594 }
 0x86d   :  { %v870_v39 = vmul.f32 %v2131_v29, %v862_v36  ;;  %v863_v40 = vmul.f32 %v2595_v38, %v831_v3  ;;  %v877_v42 = vadd.f32 %v2132_v35, %v869_v37 }
 0x86f   :  { %v871_v43 = vmul.f32 %v2131_v29, %v863_v40  ;;  %v880_v44 = vpack.c.bf16 %v877_v42, %v876_v41  ;;  %v878_v45 = vadd.f32 %v2132_v35, %v870_v39  ;;  %v2521_v40 = vld [vmem:[#allocation8 + $0xb0] sm:$0xff]   ;;  %v2522_v41 = vld [vmem:[#allocation8 + $0xb8] sm:$0xff]   ;;  %v2955_v42 = vld [vmem:[#allocation9] sm:$0xff]  }
 0x870   :  { %2472 = vmatprep.subr.bf16.mxu1 %v2955_v42 }
 0x871   :  { %2362 = vmatprep.mubr.msk.bf16.mxu0 %vm221_vm0, %v880_v44  ;;  %v879_v46 = vadd.f32 %v2132_v35, %v871_v43  ;;  %v2960_v43 = vld [vmem:[#allocation9 + $0x8] sm:$0xff]   ;;  %v2964_v44 = vld [vmem:[#allocation9 + $0x10] sm:$0xff]  }
 0x873   :  { %v881_v48 = vpack.c.bf16 %v879_v46, %v878_v45  ;;  %v2968_v45 = vld [vmem:[#allocation9 + $0x18] sm:$0xff]   ;;  %v2972_v46 = vld [vmem:[#allocation9 + $0x20] sm:$0xff]  }
 0x875   :  { %2363 = vmatmul.mubr.msk.bf16.vlgmr.msra.gmra.mrb[12].mxu0 %vm221_vm0, %v881_v48  ;;  %v2976_v48 = vld [vmem:[#allocation9 + $0x28] sm:$0xff]  }
 0x876   :  { %2382 = vmatprep.mubr.msk.bf16.mxu0 %vm2729_vm1, %v2728_v21  ;;  %2379 = vmatpush3.bf16.msra.mxu0 %v2521_v40  ;;  %v2562_v40 = vld [vmem:[#allocation6 + $0xf8] sm:$0xff]  }
 0x877   :  { %2380 = vmatprep.subr.bf16.mxu0 %v2728_v21 }
 0x87a   :  { %2381 = vmatpush3.bf16.msra.mxu0 %v2522_v41  ;;  %v2532_v41 = vld [vmem:[#allocation6 + $0x8] sm:$0xff]  }
 0x87b   :  { %2386 = vmatprep.subr.bf16.mxu0 %v2955_v42 }
 0x948   :  { %v2364_v19 = vpop.f32.mrb[12].mxu0 }
 0x949   :  { %v952_v55 = vadd.f32 %v2364_v19, %v2133_v12  ;;  %v943_v56 = vpop.f32.mrb[13].mxu0  ;;  %v2550_v19 = vld [vmem:[#allocation6 + $0x98] sm:$0xff]  }
 0x94a   :  { %v944_v57 = vadd.f32 %v2133_v12, %v943_v56  ;;  %v2365_v58 = vpop.f32.mrb[14].mxu0 }
 0x94b   :  { %v964_v16 = vmul.f32 0.044715, %v952_v55  ;;  %v955_v59 = vadd.f32 %v2365_v58, %v2133_v12  ;;  %v946_v60 = vpop.f32.mrb[15].mxu0  ;;  %v960_v28 = vmul.f32 0.5, %v952_v55 }
 0x94c   :  { %v962_v61 = vmul.f32 0.044715, %v944_v57  ;;  %v947_v62 = vadd.f32 %v2133_v12, %v946_v60  ;;  %v958_v31 = vmul.f32 0.5, %v944_v57  ;;  %v2549_v12 = vld [vmem:[#allocation6 + $0x90] sm:$0xff]  }
 0x94d   :  { %v968_v63 = vmul.f32 %v964_v16, %v952_v55  ;;  %v965_v0 = vmul.f32 0.044715, %v955_v59  ;;  %v961_v29 = vmul.f32 0.5, %v955_v59 }
 0x94e   :  { %v966_v1 = vmul.f32 %v962_v61, %v944_v57  ;;  %v963_v2 = vmul.f32 0.044715, %v947_v62  ;;  %v959_v32 = vmul.f32 0.5, %v947_v62 }
 0x94f   :  { %v972_v3 = vmul.f32 %v968_v63, %v952_v55  ;;  %v969_v4 = vmul.f32 %v965_v0, %v955_v59 }
 0x950   :  { %v970_v5 = vmul.f32 %v966_v1, %v944_v57  ;;  %v967_v6 = vmul.f32 %v963_v2, %v947_v62 }
 0x951   :  { %v976_v7 = vadd.f32 %v972_v3, %v952_v55  ;;  %v973_v8 = vmul.f32 %v969_v4, %v955_v59  ;;  %v2551_v55 = vld [vmem:[#allocation6 + $0xa0] sm:$0xff]   ;;  %v2552_v3 = vld [vmem:[#allocation6 + $0xa8] sm:$0xff]  }
 0x952   :  { %v974_v9 = vadd.f32 %v970_v5, %v944_v57  ;;  %v971_v10 = vmul.f32 %v967_v6, %v947_v62  ;;  %v2553_v6 = vld [vmem:[#allocation6 + $0xb0] sm:$0xff]  }
 0x953   :  { %v980_v11 = vmul.f32 0.7978846, %v976_v7  ;;  %v977_v13 = vadd.f32 %v973_v8, %v955_v59 }
 0x954   :  { %v978_v15 = vmul.f32 0.7978846, %v974_v9  ;;  %v975_v17 = vadd.f32 %v971_v10, %v947_v62 }
 0x955   :  { %2596 = vtanh.f32 %v980_v11  ;;  %v981_v18 = vmul.f32 0.7978846, %v977_v13  ;;  %v2554_v13 = vld [vmem:[#allocation6 + $0xb8] sm:$0xff]  }
 0x956   :  { %2598 = vtanh.f32 %v978_v15  ;;  %v979_v20 = vmul.f32 0.7978846, %v975_v17  ;;  %v2555_v17 = vld [vmem:[#allocation6 + $0xc0] sm:$0xff]  }
 0x957   :  { %2600 = vtanh.f32 %v981_v18 }
 0x958   :  { %2602 = vtanh.f32 %v979_v20 }
 0x95f   :  { %v2597_v22 = vpop.eup %2596 }
 0x960   :  { %v2599_v23 = vpop.eup %2598  ;;  %v988_v24 = vadd.f32 1.0, %v2597_v22 }
 0x961   :  { %v2601_v25 = vpop.eup %2600  ;;  %v986_v26 = vadd.f32 1.0, %v2599_v23 }
 0x962   :  { %v2603_v27 = vpop.eup %2602  ;;  %v989_v30 = vadd.f32 1.0, %v2601_v25  ;;  %v992_v34 = vmul.f32 %v988_v24, %v960_v28 }
 0x963   :  { %v987_v33 = vadd.f32 1.0, %v2603_v27  ;;  %v990_v36 = vmul.f32 %v986_v26, %v958_v31  ;;  %v2556_v27 = vld [vmem:[#allocation6 + $0xc8] sm:$0xff]  }
 0x964   :  { %v993_v35 = vmul.f32 %v989_v30, %v961_v29  ;;  %v2557_v29 = vld [vmem:[#allocation6 + $0xd0] sm:$0xff]  }
 0x965   :  { %v991_v37 = vmul.f32 %v987_v33, %v959_v32 }
 0x966   :  { %v995_v38 = vpack.c.bf16 %v993_v35, %v992_v34  ;;  %v2531_v34 = vld [vmem:[#allocation6] sm:$0xff]  }
 0x967   :  { %v994_v39 = vpack.c.bf16 %v991_v37, %v990_v36  ;;  %v2558_v36 = vld [vmem:[#allocation6 + $0xd8] sm:$0xff]   ;;  %v2559_v37 = vld [vmem:[#allocation6 + $0xe0] sm:$0xff]  }
 0x969   :  { %2374 = vmatprep.mubr.msk.bf16.mxu1 %vm1028_vm3, %v994_v39  ;;  %v2561_v39 = vld [vmem:[#allocation6 + $0xf0] sm:$0xff]  }
 0x96a   :  { %2375 = vmatmul.mubr.msk.bf16.vlgmr.msra.gmra.mrb[24].mxu1 %vm1028_vm3, %v995_v38  ;;  %v2560_v38 = vld [vmem:[#allocation6 + $0xe8] sm:$0xff]  }
 0x96b   :  { %2480 = vmatpush3.bf16.msra.mxu1 %v2955_v42  ;;  %2438 = vmatprep.mubr.bf16.mxu1 %v2549_v12  ;;  %v2544_v12 = vld [vmem:[#allocation6 + $0x68] sm:$0xff]  }
 0x96c   :  { %2473 = vmatprep.subr.bf16.mxu1 %v2960_v43 }
 0x96f   :  { %2481 = vmatpush3.bf16.msra.mxu1 %v2960_v43 }
 0x970   :  { %2474 = vmatprep.subr.bf16.mxu1 %v2964_v44 }
 0x973   :  { %2482 = vmatpush3.bf16.msra.mxu1 %v2964_v44 }
 0x974   :  { %2475 = vmatprep.subr.bf16.mxu1 %v2968_v45 }
 0x977   :  { %2483 = vmatpush3.bf16.msra.mxu1 %v2968_v45 }
 0x978   :  { %2476 = vmatprep.subr.bf16.mxu1 %v2972_v46 }
 0x97b   :  { %2484 = vmatpush3.bf16.msra.mxu1 %v2972_v46 }
 0x97c   :  { %2477 = vmatprep.subr.bf16.mxu1 %v2976_v48 }
 0x97f   :  { %2485 = vmatpush3.bf16.msra.mxu1 %v2976_v48 }
 0x980   :  { %2478 = vmatprep.subr.bf16.mxu1 %v2980_v49 }
 0x983   :  { %2486 = vmatpush3.bf16.msra.mxu1 %v2980_v49 }
 0x984   :  { %2479 = vmatprep.subr.bf16.mxu1 %v2984_v52 }
 0x987   :  { %2487 = vmatpush3.bf16.msra.mxu1 %v2984_v52 }
 0x988   :  { %2466 = vmatprep.subr.bf16.mxu1 %v2728_v21 }
 0x98a   :  { %2439 = vmatmul.mubr.bf16.vlgmr.msra.gmra.mrb[28].mxu1 %v2550_v19  ;;  %v2545_v19 = vld [vmem:[#allocation6 + $0x70] sm:$0xff]  }
 0x98b   :  { %2442 = vmatprep.mubr.bf16.mxu1 %v2551_v55  ;;  %v2546_v55 = vld [vmem:[#allocation6 + $0x78] sm:$0xff]  }
 0x992   :  { %2443 = vmatmul.mubr.bf16.gmra.mrb[32].mxu1 %v2552_v3 }
 0x993   :  { %2446 = vmatprep.mubr.bf16.mxu1 %v2553_v6 }
 0x99a   :  { %2447 = vmatmul.mubr.bf16.gmra.mrb[36].mxu1 %v2554_v13 }
 0x99b   :  { %2450 = vmatprep.mubr.bf16.mxu1 %v2555_v17 }
 0x9a2   :  { %2451 = vmatmul.mubr.bf16.gmra.mrb[40].mxu1 %v2556_v27  ;;  %v3080_v27 = vld [vmem:[%s3275_s6] ss:$0 sm:$0xff] }
 0x9a3   :  { %2454 = vmatprep.mubr.bf16.mxu1 %v2557_v29 }
 0x9aa   :  { %2455 = vmatmul.mubr.bf16.gmra.mrb[44].mxu1 %v2558_v36 }
 0x9ab   :  { %2458 = vmatprep.mubr.bf16.mxu1 %v2559_v37 }
 0x9b2   :  { %2459 = vmatmul.mubr.bf16.gmra.mrb[48].mxu1 %v2560_v38 }
 0x9b3   :  { %2462 = vmatprep.mubr.bf16.mxu1 %v2561_v39 }
 0x9ba   :  { %2463 = vmatmul.mubr.bf16.gmra.mrb[52].mxu1 %v2562_v40 }
 0x9bb   :  { %2468 = vmatprep.mubr.msk.bf16.mxu1 %vm2729_vm1, %v2728_v21  ;;  %v2537_v21 = vld [vmem:[#allocation6 + $0x30] sm:$0xff]  }
 0xa3d   :  { %v2376_v14 = vpop.f32.mrb[24].mxu1 }
 0xa3e   :  { %v1086_v56 = vadd.f32 %v2376_v14, %v2916_v50  ;;  %v1069_v57 = vpop.f32.mrb[25].mxu1  ;;  %v2543_v14 = vld [vmem:[#allocation6 + $0x60] sm:$0xff]  }
 0xa3f   :  { %v1084_v58 = vadd.f32 %v1069_v57, %v2913_v47  ;;  %v2377_v16 = vpop.f32.mrb[26].mxu1  ;;  %v2548_v57 = vld [vmem:[#allocation6 + $0x88] sm:$0xff]  }
 0xa40   :  { %v1095_v59 = vadd.f32 %v2144_v54, %v1086_v56  ;;  %v1087_v60 = vadd.f32 %v2377_v16, %v2924_v53  ;;  %v1072_v61 = vpop.f32.mrb[27].mxu1  ;;  %v2547_v56 = vld [vmem:[#allocation6 + $0x80] sm:$0xff]  }
 0xa41   :  { %v1093_v62 = vadd.f32 %v2144_v54, %v1084_v58  ;;  %v1085_v63 = vadd.f32 %v1072_v61, %v2919_v51 }
 0xa42   :  { %v1096_v0 = vadd.f32 %v2144_v54, %v1087_v60  ;;  %v1106_v2 = vsel %vm221_vm0, %v1095_v59, 0.0 }
 0xa43   :  { %v1094_v1 = vadd.f32 %v2144_v54, %v1085_v63  ;;  %v1097_v47 = vsel %vm221_vm0, %v1093_v62, 0.0  ;;  %v2541_v54 = vld [vmem:[#allocation6 + $0x50] sm:$0xff]  }
 0xa44   :  { %v1107_v50 = vsel %vm221_vm0, %v1096_v0, 0.0 }
 0xa45   :  { %v1108_v4 = vadd.f32 %v1107_v50, %v1106_v2  ;;  %v1098_v5 = vsel %vm221_vm0, %v1094_v1, 0.0 }
 0xa46   :  { %v1099_v53 = vadd.f32 %v1098_v5, %v1097_v47 }
 0xa47   :  { %v1109_v7 = vrot.slane %v1108_v4, 4 }
 0xa48   :  { %v1100_v8 = vrot.slane %v1099_v53, 4 }
 0xa49   :  { %v1110_v9 = vadd.f32 %v1109_v7, %v1108_v4 }
 0xa4a   :  { %v1101_v51 = vadd.f32 %v1100_v8, %v1099_v53 }
 0xa4b   :  { %v1111_v10 = vrot.slane %v1110_v9, 2 }
 0xa4c   :  { %v1102_v11 = vrot.slane %v1101_v51, 2 }
 0xa4d   :  { %v1112_v15 = vadd.f32 %v1111_v10, %v1110_v9 }
 0xa4e   :  { %v1103_v18 = vadd.f32 %v1102_v11, %v1101_v51 }
 0xa4f   :  { %v1113_v20 = vrot.slane %v1112_v15, 1 }
 0xa50   :  { %v1104_v22 = vrot.slane %v1103_v18, 1 }
 0xa51   :  { %v1114_v23 = vadd.f32 %v1113_v20, %v1112_v15  ;;  %v2563_v15 = vld [vmem:[#allocation9 + $0x40] sm:$0xff]  }
 0xa52   :  { %v1105_v24 = vadd.f32 %v1104_v22, %v1103_v18  ;;  %2467 = vmatpush3.bf16.msra.mxu1 %v2563_v15 }
 0xa53   :  { %v1117_v25 = vmul.f32 0.0625, %v1114_v23 }
 0xa54   :  { %v1116_v26 = vmul.f32 0.0625, %v1105_v24 }
 0xa55   :  { %v1119_v28 = vpack.c.bf16 %v1117_v25, %v1117_v25 }
 0xa56   :  { %v1118_v30 = vpack.c.bf16 %v1116_v26, %v1116_v26 }
 0xa57   :  { %v1132_v31 = vunpack.c.l.b16 %v1119_v28 }
 0xa58   :  { %v1131_v32 = vunpack.c.l.b16 %v1118_v30 }
 0xa5a   :  { %v1134_v33 = vsel %vm1133_vm4, %v1132_v31, %v1131_v32 }
 0xa5b   :  { %v1135_v35 = vpack.c.b16 %v1134_v33, %v1134_v33 }
 0xa5d   :  { %2383 = vmatmul.mubr.msk.bf16.vlgmr.msra.gmra.mrb[16].mxu0 %vm221_vm0, %v1135_v35  ;;  %v3019_v58 = vpop.f32.mrb[28].mxu1 }
 0xa5e   :  { %2387 = vmatpush3.bf16.msra.mxu0 %v2955_v42  ;;  %2402 = vmatprep.mubr.bf16.mxu0 %v2531_v34  ;;  %v2533_v42 = vld [vmem:[#allocation6 + $0x10] sm:$0xff]   ;;  %v3021_v16 = vpop.f32.mrb[29].mxu1 }
 0xa5f   :  { %2388 = vmatprep.subr.bf16.mxu0 %v2960_v43  ;;  %v3023_v59 = vpop.f32.mrb[30].mxu1 }
 0xa60   :  { %v3025_v60 = vpop.f32.mrb[31].mxu1 }
 0xa62   :  { %2389 = vmatpush3.bf16.msra.mxu0 %v2960_v43  ;;  %v2534_v43 = vld [vmem:[#allocation6 + $0x18] sm:$0xff]  }
 0xa63   :  { %2390 = vmatprep.subr.bf16.mxu0 %v2964_v44 }
 0xa65   :  { %v3027_v61 = vpop.f32.mrb[32].mxu1 }
 0xa66   :  { %2391 = vmatpush3.bf16.msra.mxu0 %v2964_v44  ;;  %v2535_v44 = vld [vmem:[#allocation6 + $0x20] sm:$0xff]   ;;  %v3029_v62 = vpop.f32.mrb[33].mxu1 }
 0xa67   :  { %2392 = vmatprep.subr.bf16.mxu0 %v2968_v45  ;;  %v3031_v63 = vpop.f32.mrb[34].mxu1 }
 0xa68   :  { %v3033_v0 = vpop.f32.mrb[35].mxu1 }
 0xa6a   :  { %2393 = vmatpush3.bf16.msra.mxu0 %v2968_v45  ;;  %v2536_v45 = vld [vmem:[#allocation6 + $0x28] sm:$0xff]  }
 0xa6b   :  { %2394 = vmatprep.subr.bf16.mxu0 %v2972_v46 }
 0xa6d   :  { %v3035_v1 = vpop.f32.mrb[36].mxu1 }
 0xa6e   :  { %2395 = vmatpush3.bf16.msra.mxu0 %v2972_v46  ;;  %v2538_v46 = vld [vmem:[#allocation6 + $0x38] sm:$0xff]   ;;  %v3037_v2 = vpop.f32.mrb[37].mxu1 }
 0xa6f   :  { %2396 = vmatprep.subr.bf16.mxu0 %v2976_v48  ;;  %v3039_v50 = vpop.f32.mrb[38].mxu1 }
 0xa70   :  { %v3041_v3 = vpop.f32.mrb[39].mxu1 }
 0xa72   :  { %2397 = vmatpush3.bf16.msra.mxu0 %v2976_v48  ;;  %v2539_v48 = vld [vmem:[#allocation6 + $0x40] sm:$0xff]  }
 0xa73   :  { %2398 = vmatprep.subr.bf16.mxu0 %v2980_v49 }
 0xa75   :  { %v3043_v47 = vpop.f32.mrb[40].mxu1 }
 0xa76   :  { %2399 = vmatpush3.bf16.msra.mxu0 %v2980_v49  ;;  %v2540_v49 = vld [vmem:[#allocation6 + $0x48] sm:$0xff]   ;;  %v3045_v4 = vpop.f32.mrb[41].mxu1 }
 0xa77   :  { %2400 = vmatprep.subr.bf16.mxu0 %v2984_v52  ;;  %v3047_v5 = vpop.f32.mrb[42].mxu1 }
 0xa78   :  { %v3051_v53 = vpop.f32.mrb[43].mxu1 }
 0xa7a   :  { %2401 = vmatpush3.bf16.msra.mxu0 %v2984_v52  ;;  %v2542_v52 = vld [vmem:[#allocation6 + $0x58] sm:$0xff]  }
 0xa7d   :  { %2403 = vmatmul.mubr.bf16.vlgmr.msra.gmra.mrb[20].mxu0 %v2532_v41  ;;  %v3053_v51 = vpop.f32.mrb[44].mxu1 }
 0xa7e   :  { %2406 = vmatprep.mubr.bf16.mxu0 %v2533_v42  ;;  %v3055_v10 = vpop.f32.mrb[45].mxu1 }
 0xa7f   :  { %v3057_v11 = vpop.f32.mrb[46].mxu1 }
 0xa80   :  { %v3059_v13 = vpop.f32.mrb[47].mxu1 }
 0xa85   :  { %2407 = vmatmul.mubr.bf16.gmra.mrb[24].mxu0 %v2534_v43  ;;  %v3061_v17 = vpop.f32.mrb[48].mxu1 }
 0xa86   :  { %2410 = vmatprep.mubr.bf16.mxu0 %v2535_v44  ;;  %v3063_v18 = vpop.f32.mrb[49].mxu1 }
 0xa87   :  { %v3065_v20 = vpop.f32.mrb[50].mxu1 }
 0xa88   :  { %v3067_v22 = vpop.f32.mrb[51].mxu1 }
 0xa8d   :  { %2411 = vmatmul.mubr.bf16.gmra.mrb[28].mxu0 %v2536_v45  ;;  %v3069_v23 = vpop.f32.mrb[52].mxu1 }
 0xa8e   :  { %2414 = vmatprep.mubr.bf16.mxu0 %v2537_v21  ;;  %v3071_v24 = vpop.f32.mrb[53].mxu1 }
 0xa8f   :  { %v3073_v25 = vpop.f32.mrb[54].mxu1 }
 0xa90   :  { %v3075_v26 = vpop.f32.mrb[55].mxu1 }
 0xa95   :  { %2415 = vmatmul.mubr.bf16.gmra.mrb[32].mxu0 %v2538_v46 }
 0xa96   :  { %2418 = vmatprep.mubr.bf16.mxu0 %v2539_v48 }
 0xa9d   :  { %2419 = vmatmul.mubr.bf16.gmra.mrb[36].mxu0 %v2540_v49 }
 0xa9e   :  { %2422 = vmatprep.mubr.bf16.mxu0 %v2541_v54 }
 0xaa5   :  { %2423 = vmatmul.mubr.bf16.gmra.mrb[40].mxu0 %v2542_v52 }
 0xaa6   :  { %2426 = vmatprep.mubr.bf16.mxu0 %v2543_v14 }
 0xaad   :  { %2427 = vmatmul.mubr.bf16.gmra.mrb[44].mxu0 %v2544_v12 }
 0xaae   :  { %2430 = vmatprep.mubr.bf16.mxu0 %v2545_v19 }
 0xab5   :  { %2431 = vmatmul.mubr.bf16.gmra.mrb[48].mxu0 %v2546_v55 }
 0xab6   :  { %2434 = vmatprep.mubr.bf16.mxu0 %v2547_v56 }
 0xabd   :  { %2435 = vmatmul.mubr.bf16.gmra.mrb[52].mxu0 %v2548_v57 }
 0xb30   :  { %v3049_v6 = vpop.f32.mrb[16].mxu0 }
 0xb31   :  { %v2384_v7 = vpop.f32.mrb[17].mxu0 }
 0xb32   :  { %v1188_v8 = vpop.f32.mrb[18].mxu0 }
 0xb33   :  { %v2385_v9 = vpop.f32.mrb[19].mxu0 }
 0xb50   :  { %v2404_v28 = vpop.f32.mrb[20].mxu0 }
 0xb51   :  { %v1550_v29 = vpop.f32.mrb[21].mxu0  ;;  %v1559_v30 = vadd.f32 %v2404_v28, %v3080_v27 }
 0xb52   :  { %v1551_v31 = vadd.f32 %v3080_v27, %v1550_v29  ;;  %v2405_v32 = vpop.f32.mrb[22].mxu0 }
 0xb53   :  { %v1553_v33 = vpop.f32.mrb[23].mxu0  ;;  %v1562_v35 = vadd.f32 %v2405_v32, %v3080_v27  ;;  %v1807_v37 = vmax.f32 %v1559_v30, 0.0 }
 0xb54   :  { %v1805_v34 = vmax.f32 %v1551_v31, 0.0  ;;  %v1554_v36 = vadd.f32 %v3080_v27, %v1553_v33 }
 0xb55   :  { %v1808_v40 = vmax.f32 %v1562_v35, 0.0  ;;  %v1872_v45 = vsel %vm598_vm2, %v1807_v37, 0.0 }
 0xb56   :  { %v1806_v38 = vmax.f32 %v1554_v36, 0.0  ;;  %v1869_v39 = vsel %vm598_vm2, %v1805_v34, 0.0 }
 0xb57   :  { %v1874_v52 = vsel %vm598_vm2, %v1808_v40, 0.0 }
 0xb58   :  { %v1870_v41 = vsel %vm598_vm2, %v1806_v38, 0.0  ;;  %v2408_v42 = vpop.f32.mrb[24].mxu0 }
 0xb59   :  { %v1871_v43 = vadd.f32 %v1870_v41, %v1869_v39  ;;  %v1566_v44 = vpop.f32.mrb[25].mxu0  ;;  %v1575_v21 = vadd.f32 %v2408_v42, %v3080_v27 }
 0xb5a   :  { %v1567_v46 = vadd.f32 %v3080_v27, %v1566_v44  ;;  %v2409_v48 = vpop.f32.mrb[26].mxu0 }
 0xb5b   :  { %v1873_v49 = vadd.f32 %v1872_v45, %v1871_v43  ;;  %v1569_v54 = vpop.f32.mrb[27].mxu0  ;;  %v1578_v12 = vadd.f32 %v2409_v48, %v3080_v27  ;;  %v1811_v56 = vmax.f32 %v1575_v21, 0.0 }
 0xb5c   :  { %v1809_v14 = vmax.f32 %v1567_v46, 0.0  ;;  %v1570_v19 = vadd.f32 %v3080_v27, %v1569_v54 }
 0xb5d   :  { %v1875_v55 = vadd.f32 %v1874_v52, %v1873_v49  ;;  %v1812_v9 = vmax.f32 %v1578_v12, 0.0  ;;  %v1880_v31 = vsel %vm598_vm2, %v1811_v56, 0.0 }
 0xb5e   :  { %v1876_v57 = vsel %vm598_vm2, %v1809_v14, 0.0  ;;  %v1810_v7 = vmax.f32 %v1570_v19, 0.0 }
 0xb5f   :  { %v1877_v8 = vadd.f32 %v1876_v57, %v1875_v55  ;;  %v1882_v37 = vsel %vm598_vm2, %v1812_v9, 0.0 }
 0xb60   :  { %v1878_v15 = vsel %vm598_vm2, %v1810_v7, 0.0  ;;  %v2412_v28 = vpop.f32.mrb[28].mxu0 }
 0xb61   :  { %v1879_v29 = vadd.f32 %v1878_v15, %v1877_v8  ;;  %v1582_v30 = vpop.f32.mrb[29].mxu0  ;;  %v1591_v32 = vadd.f32 %v2412_v28, %v3080_v27 }
 0xb62   :  { %v1583_v33 = vadd.f32 %v3080_v27, %v1582_v30  ;;  %v2413_v34 = vpop.f32.mrb[30].mxu0 }
 0xb63   :  { %v1881_v35 = vadd.f32 %v1880_v31, %v1879_v29  ;;  %v1585_v36 = vpop.f32.mrb[31].mxu0  ;;  %v1594_v39 = vadd.f32 %v2413_v34, %v3080_v27  ;;  %v1815_v42 = vmax.f32 %v1591_v32, 0.0 }
 0xb64   :  { %v1813_v38 = vmax.f32 %v1583_v33, 0.0  ;;  %v1586_v40 = vadd.f32 %v3080_v27, %v1585_v36 }
 0xb65   :  { %v1883_v41 = vadd.f32 %v1882_v37, %v1881_v35  ;;  %v1816_v21 = vmax.f32 %v1594_v39, 0.0  ;;  %v1888_v52 = vsel %vm598_vm2, %v1815_v42, 0.0 }
 0xb66   :  { %v1884_v43 = vsel %vm598_vm2, %v1813_v38, 0.0  ;;  %v1814_v44 = vmax.f32 %v1586_v40, 0.0 }
 0xb67   :  { %v1885_v45 = vadd.f32 %v1884_v43, %v1883_v41  ;;  %v1890_v57 = vsel %vm598_vm2, %v1816_v21, 0.0 }
 0xb68   :  { %v1886_v46 = vsel %vm598_vm2, %v1814_v44, 0.0  ;;  %v2416_v48 = vpop.f32.mrb[32].mxu0 }
 0xb69   :  { %v1887_v49 = vadd.f32 %v1886_v46, %v1885_v45  ;;  %v1598_v54 = vpop.f32.mrb[33].mxu0  ;;  %v1607_v14 = vadd.f32 %v2416_v48, %v3080_v27 }
 0xb6a   :  { %v1599_v12 = vadd.f32 %v3080_v27, %v1598_v54  ;;  %v2417_v19 = vpop.f32.mrb[34].mxu0 }
 0xb6b   :  { %v1889_v55 = vadd.f32 %v1888_v52, %v1887_v49  ;;  %v1601_v56 = vpop.f32.mrb[35].mxu0  ;;  %v1610_v8 = vadd.f32 %v2417_v19, %v3080_v27  ;;  %v1819_v28 = vmax.f32 %v1607_v14, 0.0 }
 0xb6c   :  { %v1817_v7 = vmax.f32 %v1599_v12, 0.0  ;;  %v1602_v9 = vadd.f32 %v3080_v27, %v1601_v56 }
 0xb6d   :  { %v1891_v15 = vadd.f32 %v1890_v57, %v1889_v55  ;;  %v1820_v32 = vmax.f32 %v1610_v8, 0.0  ;;  %v1896_v37 = vsel %vm598_vm2, %v1819_v28, 0.0 }
 0xb6e   :  { %v1892_v29 = vsel %vm598_vm2, %v1817_v7, 0.0  ;;  %v1818_v30 = vmax.f32 %v1602_v9, 0.0 }
 0xb6f   :  { %v1893_v31 = vadd.f32 %v1892_v29, %v1891_v15  ;;  %v1898_v43 = vsel %vm598_vm2, %v1820_v32, 0.0 }
 0xb70   :  { %v1894_v33 = vsel %vm598_vm2, %v1818_v30, 0.0  ;;  %v2420_v34 = vpop.f32.mrb[36].mxu0 }
 0xb71   :  { %v1895_v35 = vadd.f32 %v1894_v33, %v1893_v31  ;;  %v1614_v36 = vpop.f32.mrb[37].mxu0  ;;  %v1623_v38 = vadd.f32 %v2420_v34, %v3080_v27 }
 0xb72   :  { %v1615_v39 = vadd.f32 %v3080_v27, %v1614_v36  ;;  %v2421_v40 = vpop.f32.mrb[38].mxu0 }
 0xb73   :  { %v1897_v41 = vadd.f32 %v1896_v37, %v1895_v35  ;;  %v1617_v42 = vpop.f32.mrb[39].mxu0  ;;  %v1626_v45 = vadd.f32 %v2421_v40, %v3080_v27  ;;  %v1823_v48 = vmax.f32 %v1623_v38, 0.0 }
 0xb74   :  { %v1821_v44 = vmax.f32 %v1615_v39, 0.0  ;;  %v1618_v21 = vadd.f32 %v3080_v27, %v1617_v42 }
 0xb75   :  { %v1899_v46 = vadd.f32 %v1898_v43, %v1897_v41  ;;  %v1824_v14 = vmax.f32 %v1626_v45, 0.0  ;;  %v1904_v57 = vsel %vm598_vm2, %v1823_v48, 0.0 }
 0xb76   :  { %v1900_v49 = vsel %vm598_vm2, %v1821_v44, 0.0  ;;  %v1822_v54 = vmax.f32 %v1618_v21, 0.0 }
 0xb77   :  { %v1901_v52 = vadd.f32 %v1900_v49, %v1899_v46  ;;  %v1906_v29 = vsel %vm598_vm2, %v1824_v14, 0.0 }
 0xb78   :  { %v1902_v12 = vsel %vm598_vm2, %v1822_v54, 0.0  ;;  %v2424_v19 = vpop.f32.mrb[40].mxu0 }
 0xb79   :  { %v1903_v55 = vadd.f32 %v1902_v12, %v1901_v52  ;;  %v1630_v56 = vpop.f32.mrb[41].mxu0  ;;  %v1639_v7 = vadd.f32 %v2424_v19, %v3080_v27 }
 0xb7a   :  { %v1631_v8 = vadd.f32 %v3080_v27, %v1630_v56  ;;  %v2425_v9 = vpop.f32.mrb[42].mxu0 }
 0xb7b   :  { %v1905_v15 = vadd.f32 %v1904_v57, %v1903_v55  ;;  %v1633_v28 = vpop.f32.mrb[43].mxu0  ;;  %v1642_v31 = vadd.f32 %v2425_v9, %v3080_v27  ;;  %v1827_v34 = vmax.f32 %v1639_v7, 0.0 }
 0xb7c   :  { %v1825_v30 = vmax.f32 %v1631_v8, 0.0  ;;  %v1634_v32 = vadd.f32 %v3080_v27, %v1633_v28 }
 0xb7d   :  { %v1907_v33 = vadd.f32 %v1906_v29, %v1905_v15  ;;  %v1828_v38 = vmax.f32 %v1642_v31, 0.0  ;;  %v1912_v43 = vsel %vm598_vm2, %v1827_v34, 0.0 }
 0xb7e   :  { %v1908_v35 = vsel %vm598_vm2, %v1825_v30, 0.0  ;;  %v1826_v36 = vmax.f32 %v1634_v32, 0.0 }
 0xb7f   :  { %v1909_v37 = vadd.f32 %v1908_v35, %v1907_v33  ;;  %v1914_v49 = vsel %vm598_vm2, %v1828_v38, 0.0 }
 0xb80   :  { %v1910_v39 = vsel %vm598_vm2, %v1826_v36, 0.0  ;;  %v2428_v40 = vpop.f32.mrb[44].mxu0 }
 0xb81   :  { %v1911_v41 = vadd.f32 %v1910_v39, %v1909_v37  ;;  %v1646_v42 = vpop.f32.mrb[45].mxu0  ;;  %v1655_v44 = vadd.f32 %v2428_v40, %v3080_v27 }
 0xb82   :  { %v1647_v45 = vadd.f32 %v3080_v27, %v1646_v42  ;;  %v2429_v21 = vpop.f32.mrb[46].mxu0 }
 0xb83   :  { %v1913_v46 = vadd.f32 %v1912_v43, %v1911_v41  ;;  %v1649_v48 = vpop.f32.mrb[47].mxu0  ;;  %v1658_v52 = vadd.f32 %v2429_v21, %v3080_v27  ;;  %v1831_v19 = vmax.f32 %v1655_v44, 0.0 }
 0xb84   :  { %v1829_v54 = vmax.f32 %v1647_v45, 0.0  ;;  %v1650_v14 = vadd.f32 %v3080_v27, %v1649_v48 }
 0xb85   :  { %v1915_v12 = vadd.f32 %v1914_v49, %v1913_v46  ;;  %v1832_v7 = vmax.f32 %v1658_v52, 0.0  ;;  %v1920_v29 = vsel %vm598_vm2, %v1831_v19, 0.0 }
 0xb86   :  { %v1916_v55 = vsel %vm598_vm2, %v1829_v54, 0.0  ;;  %v1830_v56 = vmax.f32 %v1650_v14, 0.0 }
 0xb87   :  { %v1917_v57 = vadd.f32 %v1916_v55, %v1915_v12  ;;  %v1922_v35 = vsel %vm598_vm2, %v1832_v7, 0.0  ;;  %v1695_v55 = vadd.f32 %v3080_v27, %v3021_v16 }
 0xb88   :  { %v1918_v8 = vsel %vm598_vm2, %v1830_v56, 0.0  ;;  %v2432_v9 = vpop.f32.mrb[48].mxu0 }
 0xb89   :  { %v1919_v15 = vadd.f32 %v1918_v8, %v1917_v57  ;;  %v1662_v28 = vpop.f32.mrb[49].mxu0  ;;  %v1671_v30 = vadd.f32 %v2432_v9, %v3080_v27  ;;  %v1841_v16 = vmax.f32 %v1695_v55, 0.0 }
 0xb8a   :  { %v1663_v31 = vadd.f32 %v3080_v27, %v1662_v28  ;;  %v2433_v32 = vpop.f32.mrb[50].mxu0 }
 0xb8b   :  { %v1921_v33 = vadd.f32 %v1920_v29, %v1919_v15  ;;  %v1665_v34 = vpop.f32.mrb[51].mxu0  ;;  %v1674_v37 = vadd.f32 %v2433_v32, %v3080_v27  ;;  %v1835_v40 = vmax.f32 %v1671_v30, 0.0  ;;  %v1698_v29 = vadd.f32 %v3080_v27, %v3025_v60 }
 0xb8c   :  { %v1833_v36 = vmax.f32 %v1663_v31, 0.0  ;;  %v1666_v38 = vadd.f32 %v3080_v27, %v1665_v34  ;;  %v1945_v60 = vsel %vm598_vm2, %v1841_v16, 0.0 }
 0xb8d   :  { %v1923_v39 = vadd.f32 %v1922_v35, %v1921_v33  ;;  %v1836_v44 = vmax.f32 %v1674_v37, 0.0  ;;  %v1928_v49 = vsel %vm598_vm2, %v1835_v40, 0.0  ;;  %v1703_v35 = vadd.f32 %v3019_v58, %v3080_v27 }
 0xb8e   :  { %v1924_v41 = vsel %vm598_vm2, %v1833_v36, 0.0  ;;  %v1834_v42 = vmax.f32 %v1666_v38, 0.0  ;;  %v1706_v37 = vadd.f32 %v3023_v59, %v3080_v27  ;;  %v1711_v40 = vadd.f32 %v3080_v27, %v3029_v62 }
 0xb8f   :  { %v1925_v43 = vadd.f32 %v1924_v41, %v1923_v39  ;;  %v1930_v56 = vsel %vm598_vm2, %v1836_v44, 0.0  ;;  %v1842_v39 = vmax.f32 %v1698_v29, 0.0  ;;  %v1714_v58 = vadd.f32 %v3080_v27, %v3033_v0 }
 0xb90   :  { %v1926_v45 = vsel %vm598_vm2, %v1834_v42, 0.0  ;;  %v2436_v21 = vpop.f32.mrb[52].mxu0  ;;  %v1843_v42 = vmax.f32 %v1703_v35, 0.0  ;;  %v1844_v44 = vmax.f32 %v1706_v37, 0.0 }
 0xb91   :  { %v1927_v46 = vadd.f32 %v1926_v45, %v1925_v43  ;;  %v1678_v48 = vpop.f32.mrb[53].mxu0  ;;  %v1687_v54 = vadd.f32 %v2436_v21, %v3080_v27  ;;  %v1947_v45 = vsel %vm598_vm2, %v1842_v39, 0.0  ;;  %v1845_v21 = vmax.f32 %v1711_v40, 0.0 }
 0xb92   :  { %v1679_v52 = vadd.f32 %v3080_v27, %v1678_v48  ;;  %v2437_v14 = vpop.f32.mrb[54].mxu0  ;;  %v1949_v59 = vsel %vm598_vm2, %v1843_v42, 0.0  ;;  %v1719_v48 = vadd.f32 %v3027_v61, %v3080_v27  ;;  %v1730_v61 = vadd.f32 %v3080_v27, %v3041_v3 }
 0xb93   :  { %v1929_v12 = vadd.f32 %v1928_v49, %v1927_v46  ;;  %v1681_v19 = vpop.f32.mrb[55].mxu0  ;;  %v1690_v7 = vadd.f32 %v2437_v14, %v3080_v27  ;;  %v1839_v15 = vmax.f32 %v1687_v54, 0.0  ;;  %v1951_v49 = vsel %vm598_vm2, %v1844_v44, 0.0 }
 0xb94   :  { %v1837_v57 = vmax.f32 %v1679_v52, 0.0  ;;  %v1682_v8 = vadd.f32 %v3080_v27, %v1681_v19  ;;  %v1953_v62 = vsel %vm598_vm2, %v1845_v21, 0.0  ;;  %v1722_v52 = vadd.f32 %v3031_v63, %v3080_v27 }
 0xb95   :  { %v3152_v9 = vadd.f32 %v1930_v56, %v1929_v12  ;;  %v1840_v31 = vmax.f32 %v1690_v7, 0.0  ;;  %v1941_v34 = vsel %vm598_vm2, %v1839_v15, 0.0  ;;  %v1846_v14 = vmax.f32 %v1714_v58, 0.0 }
 0xb96   :  { %v1838_v28 = vmax.f32 %v1682_v8, 0.0  ;;  %v1938_v30 = vsel %vm598_vm2, %v1837_v57, 0.0  ;;  %v1727_v12 = vadd.f32 %v3080_v27, %v3037_v2  ;;  %v1847_v0 = vmax.f32 %v1719_v48, 0.0 }
 0xb97   :  { %v1943_v38 = vsel %vm598_vm2, %v1840_v31, 0.0  ;;  %v1848_v56 = vmax.f32 %v1722_v52, 0.0  ;;  %v1955_v57 = vsel %vm598_vm2, %v1846_v14, 0.0  ;;  %v1735_v63 = vadd.f32 %v3035_v1, %v3080_v27 }
 0xb98   :  { %v1939_v32 = vsel %vm598_vm2, %v1838_v28, 0.0  ;;  %v1849_v7 = vmax.f32 %v1727_v12, 0.0  ;;  %v1957_v15 = vsel %vm598_vm2, %v1847_v0, 0.0  ;;  %v1738_v2 = vadd.f32 %v3039_v50, %v3080_v27 }
 0xb99   :  { %v1940_v33 = vadd.f32 %v1939_v32, %v1938_v30  ;;  %v1959_v29 = vsel %vm598_vm2, %v1848_v56, 0.0  ;;  %v1850_v31 = vmax.f32 %v1730_v61, 0.0  ;;  %v1743_v32 = vadd.f32 %v3080_v27, %v3045_v4 }
 0xb9a   :  { %v1961_v30 = vsel %vm598_vm2, %v1849_v7, 0.0  ;;  %v1851_v3 = vmax.f32 %v1735_v63, 0.0  ;;  %v1746_v1 = vadd.f32 %v3080_v27, %v3051_v53  ;;  %v1754_v40 = vadd.f32 %v3047_v5, %v3080_v27 }
 0xb9b   :  { %v1942_v36 = vadd.f32 %v1941_v34, %v1940_v33  ;;  %v1852_v34 = vmax.f32 %v1738_v2, 0.0  ;;  %v1963_v35 = vsel %vm598_vm2, %v1850_v31, 0.0  ;;  %v1759_v42 = vadd.f32 %v3080_v27, %v3055_v10 }
 0xb9c   :  { %v1965_v50 = vsel %vm598_vm2, %v1851_v3, 0.0  ;;  %v1767_v5 = vadd.f32 %v3053_v51, %v3080_v27  ;;  %v1770_v10 = vadd.f32 %v3057_v11, %v3080_v27  ;;  %v1775_v52 = vadd.f32 %v3080_v27, %v3063_v18 }
 0xb9d   :  { %v1944_v41 = vadd.f32 %v1943_v38, %v1942_v36  ;;  %v1853_v36 = vmax.f32 %v1743_v32, 0.0  ;;  %v1751_v38 = vadd.f32 %v3043_v47, %v3080_v27  ;;  %v1857_v58 = vmax.f32 %v1759_v42, 0.0 }
 0xb9e   :  { %v1762_v47 = vadd.f32 %v3080_v27, %v3059_v13  ;;  %v1859_v13 = vmax.f32 %v1767_v5, 0.0  ;;  %v1778_v51 = vadd.f32 %v3080_v27, %v3067_v22  ;;  %v1791_v63 = vadd.f32 %v3080_v27, %v3071_v24 }
 0xb9f   :  { %v1946_v43 = vadd.f32 %v1945_v60, %v1944_v41  ;;  %v1967_v60 = vsel %vm598_vm2, %v1852_v34, 0.0  ;;  %v1969_v4 = vsel %vm598_vm2, %v1853_v36, 0.0  ;;  %v1854_v41 = vmax.f32 %v1746_v1, 0.0 }
 0xba0   :  { %v1855_v53 = vmax.f32 %v1751_v38, 0.0  ;;  %v1981_v11 = vsel %vm598_vm2, %v1859_v13, 0.0  ;;  %v1932_v2 = vrot.slane %v3152_v9, 4  ;;  %v1865_v31 = vmax.f32 %v1791_v63, 0.0 }
 0xba1   :  { %v1948_v46 = vadd.f32 %v1947_v45, %v1946_v43  ;;  %v1856_v45 = vmax.f32 %v1754_v40, 0.0  ;;  %v1971_v21 = vsel %vm598_vm2, %v1854_v41, 0.0  ;;  %v1794_v32 = vadd.f32 %v3080_v27, %v3075_v26 }
 0xba2   :  { %v1933_v24 = vadd.f32 %v1932_v2, %v3152_v9  ;;  %v1802_v36 = vadd.f32 %v3073_v25, %v3080_v27  ;;  %v2074_v13 = vstv %s3269_s0 }
 0xba3   :  { %v1950_v54 = vadd.f32 %v1949_v59, %v1948_v46  ;;  %v1973_v59 = vsel %vm598_vm2, %v1855_v53, 0.0  ;;  %v1866_v1 = vmax.f32 %v1794_v32, 0.0 }
 0xba4   :  { %v1934_v26 = vrot.slane %v1933_v24, 2 }
 0xba5   :  { %v1952_v19 = vadd.f32 %v1951_v49, %v1950_v54  ;;  %v1975_v49 = vsel %vm598_vm2, %v1856_v45, 0.0  ;;  %v1977_v54 = vsel %vm598_vm2, %v1857_v58, 0.0 }
 0xba6   :  { %v1935_v9 = vadd.f32 %v1934_v26, %v1933_v24 }
 0xba7   :  { %v1954_v55 = vadd.f32 %v1953_v62, %v1952_v19  ;;  %v1858_v62 = vmax.f32 %v1762_v47, 0.0  ;;  %v1860_v19 = vmax.f32 %v1770_v10, 0.0 }
 0xba9   :  { %v1956_v8 = vadd.f32 %v1955_v57, %v1954_v55  ;;  %v1979_v0 = vsel %vm598_vm2, %v1858_v62, 0.0  ;;  %v1861_v55 = vmax.f32 %v1775_v52, 0.0  ;;  %v1783_v57 = vadd.f32 %v3061_v17, %v3080_v27  ;;  %v2145_v62 = vld [vmem:[%s3273_s4 + $0x7] ss:$0 sm:$0xff]  ;;  %v2190_v52 = vld [vmem:[%s3275_s6 + $0x1] ss:$0 sm:$0xff] }
 0xbaa   :  { %v1983_v7 = vsel %vm598_vm2, %v1860_v19, 0.0  ;;  %v2077_v19 = vstv %s2076_s21  ;;  %s2730_s4 = smov [#allocation11]  }
 0xbab   :  { %v1958_v28 = vadd.f32 %v1957_v15, %v1956_v8  ;;  %v1985_v18 = vsel %vm598_vm2, %v1861_v55, 0.0  ;;  %v1786_v8 = vadd.f32 %v3065_v20, %v3080_v27  ;;  %v1862_v15 = vmax.f32 %v1778_v51, 0.0  ;;  %s2087_s3 = sshll.u32 %s2730_s4, 4  ;;  %s2088_s3 = int_to_ptr.vmem [resolvable:$true] %s2087_s3 }
 0xbac   :  { %v1863_v22 = vmax.f32 %v1783_v57, 0.0  ;;  %v1799_v20 = vadd.f32 %v3069_v23, %v3080_v27  ;;  %s2692_s6 = scalar_lea.vmem %s2088_s3, 32  ;;  %p2697_p5 = scmp.lt.s32.totalorder %s2088_s3, %s2088_s3 }
 0xbad   :  { %v1960_v16 = vadd.f32 %v1959_v29, %v1958_v28  ;;  %v1987_v17 = vsel %vm598_vm2, %v1862_v15, 0.0  ;;  %p2693_p4 = scmp.ne.s32.totalorder %s2088_s3, %s2692_s6  ;;  %p2698_p6 = scmp.lt.s32.totalorder %s2692_s6, %s2692_s6 }
 0xbae   :  { %v1989_v3 = vsel %vm598_vm2, %v1863_v22, 0.0 }
 0xbaf   :  { %v1962_v33 = vadd.f32 %v1961_v30, %v1960_v16  ;;  %v1864_v30 = vmax.f32 %v1786_v8, 0.0  ;;  %p2699_p7 = por %p2698_p6, %p2697_p5 }
 0xbb1   :  { %v1964_v37 = vadd.f32 %v1963_v35, %v1962_v33  ;;  %v1991_v34 = vsel %vm598_vm2, %v1864_v30, 0.0  ;;  %v1993_v35 = vsel %vm598_vm2, %v1865_v31, 0.0  ;;  %p2700_p8 = pnand %p2699_p7, %p2693_p4 }
 0xbb3   :  { %v1966_v39 = vadd.f32 %v1965_v50, %v1964_v37  ;;  %v1867_v50 = vmax.f32 %v1799_v20, 0.0 }
 0xbb5   :  { %v1968_v43 = vadd.f32 %v1967_v60, %v1966_v39  ;;  %v1868_v60 = vmax.f32 %v1802_v36, 0.0  ;;  %v1995_v39 = vsel %vm598_vm2, %v1866_v1, 0.0  ;;  %v1997_v23 = vsel %vm598_vm2, %v1867_v50, 0.0 }
 0xbb7   :  { %v1970_v44 = vadd.f32 %v1969_v4, %v1968_v43  ;;  %v1999_v41 = vsel %vm598_vm2, %v1868_v60, 0.0  ;;  %v1936_v43 = vrot.slane %v1935_v9, 1 }
 0xbb9   :  { %v1972_v46 = vadd.f32 %v1971_v21, %v1970_v44  ;;  %v1937_v25 = vadd.f32 %v1936_v43, %v1935_v9 }
 0xbbb   :  { %v1974_v48 = vadd.f32 %v1973_v59, %v1972_v46  ;;  %v2008_v21 = vmul.f32 0.00390625, %v1937_v25 }
 0xbbd   :  { %v1976_v14 = vadd.f32 %v1975_v49, %v1974_v48  ;;  %v2010_v46 = vpack.c.bf16 %v2008_v21, %v2008_v21 }
 0xbbf   :  { %v1978_v12 = vadd.f32 %v1977_v54, %v1976_v14  ;;  %v2021_v48 = vunpack.c.l.b16 %v2010_v46  ;;  %v1186_v14 = vadd.f32 %v2145_v62, %v3049_v6 }
 0xbc1   :  { %v1980_v56 = vadd.f32 %v1979_v0, %v1978_v12 }
 0xbc3   :  { %v1982_v61 = vadd.f32 %v1981_v11, %v1980_v56  ;;  %v2075_v56 = vmul.f32 %v2074_v13, %v1186_v14 }
 0xbc5   :  { %v1984_v28 = vadd.f32 %v1983_v7, %v1982_v61 }
 0xbc7   :  { %v1986_v29 = vadd.f32 %v1985_v18, %v1984_v28 }
 0xbc9   :  { %v1988_v16 = vadd.f32 %v1987_v17, %v1986_v29 }
 0xbcb   :  { %v1990_v33 = vadd.f32 %v1989_v3, %v1988_v16 }
 0xbcd   :  { %v1992_v37 = vadd.f32 %v1991_v34, %v1990_v33 }
 0xbcf   :  { %v1994_v38 = vadd.f32 %v1993_v35, %v1992_v37 }
 0xbd1   :  { %v1996_v4 = vadd.f32 %v1995_v39, %v1994_v38 }
 0xbd3   :  { %v1998_v40 = vadd.f32 %v1997_v23, %v1996_v4 }
 0xbd5   :  { %v2000_v42 = vadd.f32 %v1999_v41, %v1998_v40 }
 0xbd7   :  { %v2001_v53 = vrot.slane %v2000_v42, 4 }
 0xbd9   :  { %v2002_v44 = vadd.f32 %v2001_v53, %v2000_v42 }
 0xbdb   :  { %v2003_v27 = vrot.slane %v2002_v44, 2 }
 0xbdd   :  { %v2004_v45 = vadd.f32 %v2003_v27, %v2002_v44 }
 0xbdf   :  { %v2005_v58 = vrot.slane %v2004_v45, 1 }
 0xbe1   :  { %v2006_v47 = vadd.f32 %v2005_v58, %v2004_v45 }
 0xbe3   :  { %v2009_v59 = vmul.f32 0.00390625, %v2006_v47 }
 0xbe5   :  { %v2011_v5 = vpack.c.bf16 %v2009_v59, %v2009_v59 }
 0xbe7   :  { %v2022_v10 = vunpack.c.l.b16 %v2011_v5 }
 0xbe9   :  { %v2023_v49 = vsel %vm1133_vm4, %v2022_v10, %v2021_v48 }
 0xbea   :  { %v2024_v54 = vpack.c.b16 %v2023_v49, %v2023_v49 }
 0xbec   :  { %2469 = vmatmul.mubr.msk.bf16.vlgmr.msra.gmra.mrb[56].mxu1 %vm598_vm2, %v2024_v54 }
 0xcbf   :  { %v2068_v12 = vpop.f32.mrb[56].mxu1 }
 0xcc0   :  { %v2069_v0 = vadd.f32 %v2190_v52, %v2068_v12  ;;  %v2470_v55 = vpop.f32.mrb[57].mxu1 }
 0xcc1   :  { %v2071_v51 = vpop.f32.mrb[58].mxu1 }
 0xcc2   :  { %v2078_v11 = vmul.f32 %v2077_v19, %v2069_v0  ;;  %v2471_v57 = vpop.f32.mrb[59].mxu1 }
 0xcc4   :  { %v2079_v7 = vadd.f32 %v2078_v11, %v2075_v56 }
 0xcc6   :  { %2080 = vst [vmem:[#allocation11] sm:$0x3] %v2079_v7 }
 0xcc7   :  { %2703 = shalt.err (!%p2700_p8)
}
 0xcc8   :  { %s2704_s5 = scalar_lea.hbm %s3276_s7, 32 }
 0xcc9   :  { %p2705_p9 = scmp.ne.s32.totalorder %s3276_s7, %s2704_s5  ;;  %p2708_p10 = scmp.lt.u32.totalorder %s2704_s5, %s3276_s7 }
 0xccb   :  { %p2710_p11 = pnand %p2708_p10, %p2705_p9 }
 0xccd   :  { %2713 = shalt.err (!%p2710_p11)
}
 0xcce   :  { %2090 = dma.vmem_to_hbm [thread:$0]  %s2088_s3, 32, %s3276_s7, [#allocation5]  }
 0xccf   :  { %2720 = dma.done.wait [#allocation5], 32  }
 0xcd0   :  { %2721 = vsyncadd [#allocation5], 4294967264 }
 0xcd1   :  { %2094 = vsyncpa [#allocation4], 1 }
 0xcd2   :  { %2095 = vsyncpa [#allocation7], 1 }
 0xcd3   :  { %2096 = vsyncpa [#allocation10], 1 }
 0xcd4   :  { %2097 = vsyncpa [#allocation5], 1 }

</bundles_post_ra>
